<compile_context>
chip_gen: v7x
topology: tpu7x:2x2x1
jax: 0.10.0
libtpu: 0.0.40
codegen_flags: <defaults>
</compile_context>

<pallas_src>
import functools

import jax
import jax.numpy as jnp
from jax.experimental import pallas as pl
from jax.experimental.pallas import tpu as pltpu


LAYER_KEYS = ("wqkv", "bqkv", "wo", "bo", "g1", "be1",
              "w1", "b1", "w2", "b2", "g2", "be2")
BF16_KEYS = ("wqkv", "wo", "w1", "w2")          # MXU-fed weights stored in bf16


# ----------------------------- kernel -----------------------------------------


def _layernorm(x, gamma, beta, eps=1e-5):
    mean = jnp.mean(x, axis=-1, keepdims=True)
    var = jnp.mean((x - mean) ** 2, axis=-1, keepdims=True)
    return (x - mean) * jax.lax.rsqrt(var + eps) * gamma + beta


def fused_encoder_kernel(
    x_ref,                                   # (T_pad, D) f32  embedded input (this batch)
    wqkv_ref, bqkv_ref,                      # (D, 3D) bf16, (1, 3D) f32   fused q|k|v
    wo_ref, bo_ref,                          # (D, D) bf16,  (1, D) f32
    g1_ref, be1_ref,                         # (1, D) f32   LayerNorm 1
    w1_ref, b1_ref,                          # (D, FF) bf16, (1, FF) f32
    w2_ref, b2_ref,                          # (FF, D) bf16, (1, D) f32
    g2_ref, be2_ref,                         # (1, D) f32   LayerNorm 2
    ng_ref, nb_ref,                          # (1, D) f32   final LayerNorm (head)
    fcw_ref, fcb_ref,                        # (D, C) bf16, (1, C) f32
    o_ref,                                   # (1, C) f32   logits (this batch)
    h_ref,                                   # scratch (T_pad, D) f32, carried over layers
    *,
    num_heads, t_valid,
):
    l = pl.program_id(1)
    t_pad, d = h_ref.shape
    hd = d // num_heads
    scale = 1.0 / float(hd) ** 0.5

    # load the embedded input into the carried activation on the first layer
    @pl.when(l == 0)
    def _():
        h_ref[...] = x_ref[...]

    x = h_ref[...]                                            # (T_pad, D) f32
    x_bf = x.astype(jnp.bfloat16)

    # key-padding additive bias built in-kernel (VPU iota) -- no HBM bias array.
    col = jax.lax.broadcasted_iota(jnp.int32, (t_pad, t_pad), 1)
    kbias = jnp.where(col < t_valid, 0.0, -1e30).astype(jnp.float32)

    # ---- fused QKV projection: one bf16 matmul for all heads and q/k/v ----
    qkv = (jnp.dot(x_bf, wqkv_ref[...], preferred_element_type=jnp.float32)
           + bqkv_ref[...])                                    # (T_pad, 3D) f32

    # ---- multi-head self attention; accumulate wo projection per head (no concat) ----
    attn = jnp.zeros((t_pad, d), jnp.float32)
    for h in range(num_heads):
        q = qkv[:, h * hd:(h + 1) * hd]                        # (T_pad, hd) f32
        k = qkv[:, d + h * hd:d + (h + 1) * hd]
        v = qkv[:, 2 * d + h * hd:2 * d + (h + 1) * hd]
        s = pl.dot(q, k, trans_b=True) * scale + kbias         # (T_pad, T_pad) f32
        s = s - jnp.max(s, axis=-1, keepdims=True)
        p = jnp.exp(s)
        p = p / jnp.sum(p, axis=-1, keepdims=True)             # exact softmax (parity)
        ctx = jnp.dot(p, v, preferred_element_type=jnp.float32)  # (T_pad, hd)
        attn = attn + jnp.dot(ctx.astype(jnp.bfloat16),
                              wo_ref[h * hd:(h + 1) * hd, :],
                              preferred_element_type=jnp.float32)
    attn = attn + bo_ref[...]

    # residual + LayerNorm1 (post-norm encoder layer, eval mode)
    h1 = _layernorm(x + attn, g1_ref[...], be1_ref[...])

    # ---- feed-forward (Linear -> ReLU -> Linear), residual + LayerNorm2 ----
    ff = (jnp.dot(h1.astype(jnp.bfloat16), w1_ref[...],
                  preferred_element_type=jnp.float32) + b1_ref[...])
    ff = jnp.maximum(ff, 0.0)
    ff = (jnp.dot(ff.astype(jnp.bfloat16), w2_ref[...],
                  preferred_element_type=jnp.float32) + b2_ref[...])
    h2 = _layernorm(h1 + ff, g2_ref[...], be2_ref[...])

    h_ref[...] = h2

    # ---- classifier head fused into the last layer step ----
    @pl.when(l == pl.num_programs(1) - 1)
    def _():
        cls = h2[0:1, :]                                       # CLS = row 0 of this batch
        cls = _layernorm(cls, ng_ref[...], nb_ref[...])
        o_ref[...] = (jnp.dot(cls.astype(jnp.bfloat16), fcw_ref[...],
                              preferred_element_type=jnp.float32)
                      + fcb_ref[...]).astype(o_ref.dtype)


# ----------------------------- wrapper -----------------------------------------


def classification_transformer_forward(tokens, params, num_heads):
    # glue: embedding gathers, positional ids, [CLS] prepend, padding (plain JAX)
    bsz, seq = tokens.shape
    emb = params["embedding"][tokens]                          # (B, S, D)
    d = emb.shape[-1]
    pos = params["pos_embedding"][:seq][None, :, :]            # (1, S, D)
    x = emb + pos
    cls = jnp.broadcast_to(params["cls_token"], (bsz, 1, d))
    x = jnp.concatenate([cls, x], axis=1)                      # (B, T, D), T = S + 1

    t = seq + 1
    t_pad = ((t + 7) // 8) * 8                                 # sublane-aligned rows
    x = jnp.pad(x, ((0, 0), (0, t_pad - t), (0, 0))).astype(jnp.float32)

    stacked = [params[k] for k in LAYER_KEYS]                  # each (L, ...)
    head = [params["norm_g"], params["norm_b"], params["fc_w"], params["fc_b"]]
    num_layers = stacked[0].shape[0]
    num_classes = params["fc_w"].shape[1]

    def full_spec(a):
        nd = a.ndim
        return pl.BlockSpec(a.shape, lambda b, l, _nd=nd: (0,) * _nd)

    def layer_spec(a):
        nd = a.ndim
        return pl.BlockSpec((None,) + tuple(a.shape[1:]),
                            lambda b, l, _nd=nd: (l,) + (0,) * (_nd - 1))

    in_specs = ([pl.BlockSpec((None, t_pad, d), lambda b, l: (b, 0, 0))]
                + [layer_spec(a) for a in stacked]
                + [full_spec(a) for a in head])

    kernel = functools.partial(fused_encoder_kernel,
                               num_heads=num_heads, t_valid=t)

    out = pl.pallas_call(
        kernel,
        out_shape=jax.ShapeDtypeStruct((bsz, 1, num_classes), jnp.float32),
        grid=(bsz, num_layers),
        in_specs=in_specs,
        out_specs=pl.BlockSpec((None, 1, num_classes), lambda b, l: (b, 0, 0)),
        scratch_shapes=[pltpu.VMEM((t_pad, d), jnp.float32)],
        compiler_params=pltpu.CompilerParams(
            dimension_semantics=("parallel", "arbitrary")),
    )(x, *stacked, *head)
    return out[:, 0, :]                                        # (B, C)


# ----------------------------- deterministic init ------------------------------


def _xavier_uniform(key, shape, fan_in, fan_out):
    lim = (6.0 / (fan_in + fan_out)) ** 0.5
    return jax.random.uniform(key, shape, jnp.float32, -lim, lim)


def init_params(key, vocab_size, emb_dim, num_heads, num_layers, max_len,
                num_classes, ff_dim):
    del num_heads
    keys = jax.random.split(key, 4 + num_layers)

    embedding = jax.random.normal(keys[0], (vocab_size, emb_dim), jnp.float32)
    embedding = embedding.at[0].set(0.0)                       # padding_idx = 0
    pos_embedding = jax.random.normal(keys[1], (max_len, emb_dim), jnp.float32)
    cls_token = _xavier_uniform(keys[2], (1, 1, emb_dim), emb_dim, emb_dim)

    norm_g = jnp.ones((1, emb_dim), jnp.float32)
    norm_b = jnp.zeros((1, emb_dim), jnp.float32)
    fc_w = _xavier_uniform(keys[3], (emb_dim, num_classes), emb_dim, num_classes)
    fc_b = jnp.zeros((1, num_classes), jnp.float32)

    per_layer = {k: [] for k in LAYER_KEYS}
    for l in range(num_layers):
        lk = jax.random.split(keys[4 + l], 8)
        wq = _xavier_uniform(lk[0], (emb_dim, emb_dim), emb_dim, emb_dim)
        wk = _xavier_uniform(lk[1], (emb_dim, emb_dim), emb_dim, emb_dim)
        wv = _xavier_uniform(lk[2], (emb_dim, emb_dim), emb_dim, emb_dim)
        wo = _xavier_uniform(lk[3], (emb_dim, emb_dim), emb_dim, emb_dim)
        vals = dict(
            wqkv=jnp.concatenate([wq, wk, wv], axis=1),        # fused (D, 3D)
            bqkv=jnp.zeros((1, 3 * emb_dim), jnp.float32),
            wo=wo,
            bo=jnp.zeros((1, emb_dim), jnp.float32),
            g1=jnp.ones((1, emb_dim), jnp.float32),
            be1=jnp.zeros((1, emb_dim), jnp.float32),
            w1=_xavier_uniform(lk[4], (emb_dim, ff_dim), emb_dim, ff_dim),
            b1=0.01 * jax.random.normal(lk[5], (1, ff_dim), jnp.float32),
            w2=_xavier_uniform(lk[6], (ff_dim, emb_dim), ff_dim, emb_dim),
            b2=0.01 * jax.random.normal(lk[7], (1, emb_dim), jnp.float32),
            g2=jnp.ones((1, emb_dim), jnp.float32),
            be2=jnp.zeros((1, emb_dim), jnp.float32),
        )
        for k in LAYER_KEYS:
            per_layer[k].append(vals[k])

    params = {
        "embedding": embedding,
        "pos_embedding": pos_embedding,
        "cls_token": cls_token,
        "norm_g": norm_g, "norm_b": norm_b,
        "fc_w": fc_w.astype(jnp.bfloat16), "fc_b": fc_b,
    }
    for k in LAYER_KEYS:
        w = jnp.stack(per_layer[k], axis=0)                    # (L, ...)
        if k in BF16_KEYS:
            w = w.astype(jnp.bfloat16)                         # bf16 MXU feeding
        params[k] = w
    return params


# ----------------------------- main --------------------------------------------


if __name__ == "__main__":
    # small but module-consistent shapes
    VOCAB = 50
    EMB_DIM = 32
    NUM_HEADS = 4
    NUM_LAYERS = 2
    MAX_LEN = 64
    NUM_CLASSES = 2
    FF_DIM = 2048          # PyTorch TransformerEncoderLayer default dim_feedforward
    BATCH = 2
    SEQ = 8

    key = jax.random.PRNGKey(0)
    pkey, tkey = jax.random.split(key)
    params = init_params(pkey, VOCAB, EMB_DIM, NUM_HEADS, NUM_LAYERS,
                         MAX_LEN, NUM_CLASSES, FF_DIM)
    tokens = jax.random.randint(tkey, (BATCH, SEQ), 0, VOCAB, dtype=jnp.int32)

    logits = classification_transformer_forward(tokens, params, NUM_HEADS)
    logits = jax.block_until_ready(logits)

    assert logits.shape == (BATCH, NUM_CLASSES)
    assert bool(jnp.all(jnp.isfinite(logits)))
    print("KERNEL_OK")
</pallas_src>

<mosaic_0001>
module attributes {stable_mosaic.version = 11 : i64} {
  func.func @fused_encoder_kernel(%arg0: i32, %arg1: i32, %arg2: memref<1x16x32xf32, #tpu.memory_space<vmem>>, %arg3: memref<1x32x96xbf16, #tpu.memory_space<vmem>>, %arg4: memref<1x1x96xf32, #tpu.memory_space<vmem>>, %arg5: memref<1x32x32xbf16, #tpu.memory_space<vmem>>, %arg6: memref<1x1x32xf32, #tpu.memory_space<vmem>>, %arg7: memref<1x1x32xf32, #tpu.memory_space<vmem>>, %arg8: memref<1x1x32xf32, #tpu.memory_space<vmem>>, %arg9: memref<1x32x2048xbf16, #tpu.memory_space<vmem>>, %arg10: memref<1x1x2048xf32, #tpu.memory_space<vmem>>, %arg11: memref<1x2048x32xbf16, #tpu.memory_space<vmem>>, %arg12: memref<1x1x32xf32, #tpu.memory_space<vmem>>, %arg13: memref<1x1x32xf32, #tpu.memory_space<vmem>>, %arg14: memref<1x1x32xf32, #tpu.memory_space<vmem>>, %arg15: memref<1x32xf32, #tpu.memory_space<vmem>>, %arg16: memref<1x32xf32, #tpu.memory_space<vmem>>, %arg17: memref<32x2xbf16, #tpu.memory_space<vmem>>, %arg18: memref<1x2xf32, #tpu.memory_space<vmem>>, %arg19: memref<1x1x2xf32, #tpu.memory_space<vmem>>, %arg20: memref<16x32xf32, #tpu.memory_space<vmem>>) attributes {dimension_semantics = [#tpu.dimension_semantics<parallel>, #tpu.dimension_semantics<arbitrary>], iteration_bounds = array<i64: 2, 2>, scalar_prefetch = 0 : i64, scratch_operands = 1 : i64, tpu.core_type = #tpu.core_type<tc>, window_params = [{transform_indices = @transform_0, window_bounds = array<i64: 1, 16, 32>}, {transform_indices = @transform_1, window_bounds = array<i64: 1, 32, 96>}, {transform_indices = @transform_2, window_bounds = array<i64: 1, 1, 96>}, {transform_indices = @transform_3, window_bounds = array<i64: 1, 32, 32>}, {transform_indices = @transform_4, window_bounds = array<i64: 1, 1, 32>}, {transform_indices = @transform_5, window_bounds = array<i64: 1, 1, 32>}, {transform_indices = @transform_6, window_bounds = array<i64: 1, 1, 32>}, {transform_indices = @transform_7, window_bounds = array<i64: 1, 32, 2048>}, {transform_indices = @transform_8, window_bounds = array<i64: 1, 1, 2048>}, {transform_indices = @transform_9, window_bounds = array<i64: 1, 2048, 32>}, {transform_indices = @transform_10, window_bounds = array<i64: 1, 1, 32>}, {transform_indices = @transform_11, window_bounds = array<i64: 1, 1, 32>}, {transform_indices = @transform_12, window_bounds = array<i64: 1, 1, 32>}, {pipeline_mode = #tpu.pipeline_mode<synchronous>, transform_indices = @transform_13, window_bounds = array<i64: 1, 32>}, {pipeline_mode = #tpu.pipeline_mode<synchronous>, transform_indices = @transform_14, window_bounds = array<i64: 1, 32>}, {pipeline_mode = #tpu.pipeline_mode<synchronous>, transform_indices = @transform_15, window_bounds = array<i64: 32, 2>}, {pipeline_mode = #tpu.pipeline_mode<synchronous>, transform_indices = @transform_16, window_bounds = array<i64: 1, 2>}, {transform_indices = @transform_17, window_bounds = array<i64: 1, 1, 2>}]} {
    %c0_i32 = arith.constant 0 : i32
    %0 = arith.cmpi eq, %arg1, %c0_i32 : i32
    %1 = arith.extui %0 : i1 to i32
    %c0_i32_0 = arith.constant 0 : i32
    %2 = arith.cmpi ne, %1, %c0_i32_0 : i32
    scf.if %2 {
      %c0_87 = arith.constant 0 : index
      %c0_88 = arith.constant 0 : index
      %c0_89 = arith.constant 0 : index
      %187 = vector.load %arg2[%c0_87, %c0_88, %c0_89] : memref<1x16x32xf32, #tpu.memory_space<vmem>>, vector<1x16x32xf32>
      %188 = vector.shape_cast %187 : vector<1x16x32xf32> to vector<16x32xf32>
      %c0_90 = arith.constant 0 : index
      %c0_91 = arith.constant 0 : index
      %189 = vector.load %arg20[%c0_90, %c0_91] : memref<16x32xf32, #tpu.memory_space<vmem>>, vector<16x32xf32>
      tpu.vector_store %arg20[%c0_90, %c0_91], %188 {strides = array<i32>} : memref<16x32xf32, #tpu.memory_space<vmem>>, vector<16x32xf32>,
    } else {
    }
    %c0 = arith.constant 0 : index
    %c0_1 = arith.constant 0 : index
    %3 = vector.load %arg20[%c0, %c0_1] : memref<16x32xf32, #tpu.memory_space<vmem>>, vector<16x32xf32>
    %4 = arith.truncf %3 : vector<16x32xf32> to vector<16x32xbf16>
    %5 = tpu.iota {dimensions = array<i32: 1>} : vector<16x16xi32>
    %c9_i32 = arith.constant 9 : i32
    %6 = vector.broadcast %c9_i32 : i32 to vector<16x16xi32>
    %7 = arith.cmpi slt, %5, %6 : vector<16x16xi32>
    %cst = arith.constant 0.000000e+00 : f32
    %cst_2 = arith.constant -1.000000e+30 : f32
    %8 = vector.broadcast %cst : f32 to vector<16x16xf32>
    %9 = vector.broadcast %cst_2 : f32 to vector<16x16xf32>
    %10 = arith.select %7, %8, %9 : vector<16x16xi1>, vector<16x16xf32>
    %c0_3 = arith.constant 0 : index
    %c0_4 = arith.constant 0 : index
    %c0_5 = arith.constant 0 : index
    %11 = vector.load %arg3[%c0_3, %c0_4, %c0_5] : memref<1x32x96xbf16, #tpu.memory_space<vmem>>, vector<1x32x96xbf16>
    %12 = vector.shape_cast %11 : vector<1x32x96xbf16> to vector<32x96xbf16>
    %cst_6 = arith.constant dense<0.000000e+00> : vector<16x96xf32>
    %13 = tpu.matmul %4, %12, %cst_6 {dimension_numbers = #tpu.dot_dimension_numbers<[1], [0], [0], [1], [0, 0, 1, 1], [], []>} : vector<16x32xbf16>, vector<32x96xbf16>, vector<16x96xf32> -> vector<16x96xf32>
    %c0_7 = arith.constant 0 : index
    %c0_8 = arith.constant 0 : index
    %c0_9 = arith.constant 0 : index
    %14 = vector.load %arg4[%c0_7, %c0_8, %c0_9] : memref<1x1x96xf32, #tpu.memory_space<vmem>>, vector<1x1x96xf32>
    %15 = vector.shape_cast %14 : vector<1x1x96xf32> to vector<1x96xf32>
    %16 = vector.broadcast %15 : vector<1x96xf32> to vector<16x96xf32>
    %17 = arith.addf %13, %16 : vector<16x96xf32>
    %cst_10 = arith.constant 0.000000e+00 : f32
    %18 = vector.broadcast %cst_10 : f32 to vector<16x32xf32>
    %19 = vector.extract_strided_slice %17 {offsets = [0, 0], sizes = [16, 8], strides = [1, 1]} : vector<16x96xf32> to vector<16x8xf32>
    %20 = vector.extract_strided_slice %17 {offsets = [0, 32], sizes = [16, 8], strides = [1, 1]} : vector<16x96xf32> to vector<16x8xf32>
    %21 = vector.extract_strided_slice %17 {offsets = [0, 64], sizes = [16, 8], strides = [1, 1]} : vector<16x96xf32> to vector<16x8xf32>
    %cst_11 = arith.constant dense<0.000000e+00> : vector<16x16xf32>
    %22 = tpu.matmul %19, %20, %cst_11 {dimension_numbers = #tpu.dot_dimension_numbers<[1], [1], [0], [0], [0, 0, 1, 0], [], []>} : vector<16x8xf32>, vector<16x8xf32>, vector<16x16xf32> -> vector<16x16xf32>
    %cst_12 = arith.constant 0.353553385 : f32
    %23 = vector.broadcast %cst_12 : f32 to vector<16x16xf32>
    %24 = arith.mulf %22, %23 : vector<16x16xf32>
    %25 = arith.addf %24, %10 : vector<16x16xf32>
    %cst_13 = arith.constant dense<0xFF800000> : vector<16xf32>
    %26 = vector.multi_reduction <maximumf>, %25, %cst_13 [1] : vector<16x16xf32> to vector<16xf32>
    %27 = vector.shape_cast %26 : vector<16xf32> to vector<16x1xf32>
    %28 = vector.broadcast %27 : vector<16x1xf32> to vector<16x16xf32>
    %29 = arith.subf %25, %28 : vector<16x16xf32>
    %30 = math.exp %29 : vector<16x16xf32>
    %cst_14 = arith.constant dense<0.000000e+00> : vector<16xf32>
    %31 = vector.multi_reduction <add>, %30, %cst_14 [1] : vector<16x16xf32> to vector<16xf32>
    %32 = vector.shape_cast %31 : vector<16xf32> to vector<16x1xf32>
    %33 = vector.broadcast %32 : vector<16x1xf32> to vector<16x16xf32>
    %34 = arith.divf %30, %33 : vector<16x16xf32>
    %cst_15 = arith.constant dense<0.000000e+00> : vector<16x8xf32>
    %35 = tpu.matmul %34, %21, %cst_15 {dimension_numbers = #tpu.dot_dimension_numbers<[1], [0], [0], [1], [0, 0, 1, 1], [], []>} : vector<16x16xf32>, vector<16x8xf32>, vector<16x8xf32> -> vector<16x8xf32>
    %36 = arith.truncf %35 : vector<16x8xf32> to vector<16x8xbf16>
    %c0_16 = arith.constant 0 : index
    %c0_17 = arith.constant 0 : index
    %c0_18 = arith.constant 0 : index
    %37 = vector.load %arg5[%c0_16, %c0_17, %c0_18] : memref<1x32x32xbf16, #tpu.memory_space<vmem>>, vector<1x8x32xbf16>
    %38 = vector.shape_cast %37 : vector<1x8x32xbf16> to vector<8x32xbf16>
    %cst_19 = arith.constant dense<0.000000e+00> : vector<16x32xf32>
    %39 = tpu.matmul %36, %38, %cst_19 {dimension_numbers = #tpu.dot_dimension_numbers<[1], [0], [0], [1], [0, 0, 1, 1], [], []>} : vector<16x8xbf16>, vector<8x32xbf16>, vector<16x32xf32> -> vector<16x32xf32>
    %40 = arith.addf %18, %39 : vector<16x32xf32>
    %41 = vector.extract_strided_slice %17 {offsets = [0, 8], sizes = [16, 8], strides = [1, 1]} : vector<16x96xf32> to vector<16x8xf32>
    %42 = vector.extract_strided_slice %17 {offsets = [0, 40], sizes = [16, 8], strides = [1, 1]} : vector<16x96xf32> to vector<16x8xf32>
    %43 = vector.extract_strided_slice %17 {offsets = [0, 72], sizes = [16, 8], strides = [1, 1]} : vector<16x96xf32> to vector<16x8xf32>
    %cst_20 = arith.constant dense<0.000000e+00> : vector<16x16xf32>
    %44 = tpu.matmul %41, %42, %cst_20 {dimension_numbers = #tpu.dot_dimension_numbers<[1], [1], [0], [0], [0, 0, 1, 0], [], []>} : vector<16x8xf32>, vector<16x8xf32>, vector<16x16xf32> -> vector<16x16xf32>
    %cst_21 = arith.constant 0.353553385 : f32
    %45 = vector.broadcast %cst_21 : f32 to vector<16x16xf32>
    %46 = arith.mulf %44, %45 : vector<16x16xf32>
    %47 = arith.addf %46, %10 : vector<16x16xf32>
    %cst_22 = arith.constant dense<0xFF800000> : vector<16xf32>
    %48 = vector.multi_reduction <maximumf>, %47, %cst_22 [1] : vector<16x16xf32> to vector<16xf32>
    %49 = vector.shape_cast %48 : vector<16xf32> to vector<16x1xf32>
    %50 = vector.broadcast %49 : vector<16x1xf32> to vector<16x16xf32>
    %51 = arith.subf %47, %50 : vector<16x16xf32>
    %52 = math.exp %51 : vector<16x16xf32>
    %cst_23 = arith.constant dense<0.000000e+00> : vector<16xf32>
    %53 = vector.multi_reduction <add>, %52, %cst_23 [1] : vector<16x16xf32> to vector<16xf32>
    %54 = vector.shape_cast %53 : vector<16xf32> to vector<16x1xf32>
    %55 = vector.broadcast %54 : vector<16x1xf32> to vector<16x16xf32>
    %56 = arith.divf %52, %55 : vector<16x16xf32>
    %cst_24 = arith.constant dense<0.000000e+00> : vector<16x8xf32>
    %57 = tpu.matmul %56, %43, %cst_24 {dimension_numbers = #tpu.dot_dimension_numbers<[1], [0], [0], [1], [0, 0, 1, 1], [], []>} : vector<16x16xf32>, vector<16x8xf32>, vector<16x8xf32> -> vector<16x8xf32>
    %58 = arith.truncf %57 : vector<16x8xf32> to vector<16x8xbf16>
    %c0_25 = arith.constant 0 : index
    %c8 = arith.constant 8 : index
    %c0_26 = arith.constant 0 : index
    %59 = vector.load %arg5[%c0_25, %c8, %c0_26] : memref<1x32x32xbf16, #tpu.memory_space<vmem>>, vector<1x8x32xbf16>
    %60 = vector.shape_cast %59 : vector<1x8x32xbf16> to vector<8x32xbf16>
    %cst_27 = arith.constant dense<0.000000e+00> : vector<16x32xf32>
    %61 = tpu.matmul %58, %60, %cst_27 {dimension_numbers = #tpu.dot_dimension_numbers<[1], [0], [0], [1], [0, 0, 1, 1], [], []>} : vector<16x8xbf16>, vector<8x32xbf16>, vector<16x32xf32> -> vector<16x32xf32>
    %62 = arith.addf %40, %61 : vector<16x32xf32>
    %63 = vector.extract_strided_slice %17 {offsets = [0, 16], sizes = [16, 8], strides = [1, 1]} : vector<16x96xf32> to vector<16x8xf32>
    %64 = vector.extract_strided_slice %17 {offsets = [0, 48], sizes = [16, 8], strides = [1, 1]} : vector<16x96xf32> to vector<16x8xf32>
    %65 = vector.extract_strided_slice %17 {offsets = [0, 80], sizes = [16, 8], strides = [1, 1]} : vector<16x96xf32> to vector<16x8xf32>
    %cst_28 = arith.constant dense<0.000000e+00> : vector<16x16xf32>
    %66 = tpu.matmul %63, %64, %cst_28 {dimension_numbers = #tpu.dot_dimension_numbers<[1], [1], [0], [0], [0, 0, 1, 0], [], []>} : vector<16x8xf32>, vector<16x8xf32>, vector<16x16xf32> -> vector<16x16xf32>
    %cst_29 = arith.constant 0.353553385 : f32
    %67 = vector.broadcast %cst_29 : f32 to vector<16x16xf32>
    %68 = arith.mulf %66, %67 : vector<16x16xf32>
    %69 = arith.addf %68, %10 : vector<16x16xf32>
    %cst_30 = arith.constant dense<0xFF800000> : vector<16xf32>
    %70 = vector.multi_reduction <maximumf>, %69, %cst_30 [1] : vector<16x16xf32> to vector<16xf32>
    %71 = vector.shape_cast %70 : vector<16xf32> to vector<16x1xf32>
    %72 = vector.broadcast %71 : vector<16x1xf32> to vector<16x16xf32>
    %73 = arith.subf %69, %72 : vector<16x16xf32>
    %74 = math.exp %73 : vector<16x16xf32>
    %cst_31 = arith.constant dense<0.000000e+00> : vector<16xf32>
    %75 = vector.multi_reduction <add>, %74, %cst_31 [1] : vector<16x16xf32> to vector<16xf32>
    %76 = vector.shape_cast %75 : vector<16xf32> to vector<16x1xf32>
    %77 = vector.broadcast %76 : vector<16x1xf32> to vector<16x16xf32>
    %78 = arith.divf %74, %77 : vector<16x16xf32>
    %cst_32 = arith.constant dense<0.000000e+00> : vector<16x8xf32>
    %79 = tpu.matmul %78, %65, %cst_32 {dimension_numbers = #tpu.dot_dimension_numbers<[1], [0], [0], [1], [0, 0, 1, 1], [], []>} : vector<16x16xf32>, vector<16x8xf32>, vector<16x8xf32> -> vector<16x8xf32>
    %80 = arith.truncf %79 : vector<16x8xf32> to vector<16x8xbf16>
    %c0_33 = arith.constant 0 : index
    %c16 = arith.constant 16 : index
    %c0_34 = arith.constant 0 : index
    %81 = vector.load %arg5[%c0_33, %c16, %c0_34] : memref<1x32x32xbf16, #tpu.memory_space<vmem>>, vector<1x8x32xbf16>
    %82 = vector.shape_cast %81 : vector<1x8x32xbf16> to vector<8x32xbf16>
    %cst_35 = arith.constant dense<0.000000e+00> : vector<16x32xf32>
    %83 = tpu.matmul %80, %82, %cst_35 {dimension_numbers = #tpu.dot_dimension_numbers<[1], [0], [0], [1], [0, 0, 1, 1], [], []>} : vector<16x8xbf16>, vector<8x32xbf16>, vector<16x32xf32> -> vector<16x32xf32>
    %84 = arith.addf %62, %83 : vector<16x32xf32>
    %85 = vector.extract_strided_slice %17 {offsets = [0, 24], sizes = [16, 8], strides = [1, 1]} : vector<16x96xf32> to vector<16x8xf32>
    %86 = vector.extract_strided_slice %17 {offsets = [0, 56], sizes = [16, 8], strides = [1, 1]} : vector<16x96xf32> to vector<16x8xf32>
    %87 = vector.extract_strided_slice %17 {offsets = [0, 88], sizes = [16, 8], strides = [1, 1]} : vector<16x96xf32> to vector<16x8xf32>
    %cst_36 = arith.constant dense<0.000000e+00> : vector<16x16xf32>
    %88 = tpu.matmul %85, %86, %cst_36 {dimension_numbers = #tpu.dot_dimension_numbers<[1], [1], [0], [0], [0, 0, 1, 0], [], []>} : vector<16x8xf32>, vector<16x8xf32>, vector<16x16xf32> -> vector<16x16xf32>
    %cst_37 = arith.constant 0.353553385 : f32
    %89 = vector.broadcast %cst_37 : f32 to vector<16x16xf32>
    %90 = arith.mulf %88, %89 : vector<16x16xf32>
    %91 = arith.addf %90, %10 : vector<16x16xf32>
    %cst_38 = arith.constant dense<0xFF800000> : vector<16xf32>
    %92 = vector.multi_reduction <maximumf>, %91, %cst_38 [1] : vector<16x16xf32> to vector<16xf32>
    %93 = vector.shape_cast %92 : vector<16xf32> to vector<16x1xf32>
    %94 = vector.broadcast %93 : vector<16x1xf32> to vector<16x16xf32>
    %95 = arith.subf %91, %94 : vector<16x16xf32>
    %96 = math.exp %95 : vector<16x16xf32>
    %cst_39 = arith.constant dense<0.000000e+00> : vector<16xf32>
    %97 = vector.multi_reduction <add>, %96, %cst_39 [1] : vector<16x16xf32> to vector<16xf32>
    %98 = vector.shape_cast %97 : vector<16xf32> to vector<16x1xf32>
    %99 = vector.broadcast %98 : vector<16x1xf32> to vector<16x16xf32>
    %100 = arith.divf %96, %99 : vector<16x16xf32>
    %cst_40 = arith.constant dense<0.000000e+00> : vector<16x8xf32>
    %101 = tpu.matmul %100, %87, %cst_40 {dimension_numbers = #tpu.dot_dimension_numbers<[1], [0], [0], [1], [0, 0, 1, 1], [], []>} : vector<16x16xf32>, vector<16x8xf32>, vector<16x8xf32> -> vector<16x8xf32>
    %102 = arith.truncf %101 : vector<16x8xf32> to vector<16x8xbf16>
    %c0_41 = arith.constant 0 : index
    %c24 = arith.constant 24 : index
    %c0_42 = arith.constant 0 : index
    %103 = vector.load %arg5[%c0_41, %c24, %c0_42] : memref<1x32x32xbf16, #tpu.memory_space<vmem>>, vector<1x8x32xbf16>
    %104 = vector.shape_cast %103 : vector<1x8x32xbf16> to vector<8x32xbf16>
    %cst_43 = arith.constant dense<0.000000e+00> : vector<16x32xf32>
    %105 = tpu.matmul %102, %104, %cst_43 {dimension_numbers = #tpu.dot_dimension_numbers<[1], [0], [0], [1], [0, 0, 1, 1], [], []>} : vector<16x8xbf16>, vector<8x32xbf16>, vector<16x32xf32> -> vector<16x32xf32>
    %106 = arith.addf %84, %105 : vector<16x32xf32>
    %c0_44 = arith.constant 0 : index
    %c0_45 = arith.constant 0 : index
    %c0_46 = arith.constant 0 : index
    %107 = vector.load %arg6[%c0_44, %c0_45, %c0_46] : memref<1x1x32xf32, #tpu.memory_space<vmem>>, vector<1x1x32xf32>
    %108 = vector.shape_cast %107 : vector<1x1x32xf32> to vector<1x32xf32>
    %109 = vector.broadcast %108 : vector<1x32xf32> to vector<16x32xf32>
    %110 = arith.addf %106, %109 : vector<16x32xf32>
    %111 = arith.addf %3, %110 : vector<16x32xf32>
    %c0_47 = arith.constant 0 : index
    %c0_48 = arith.constant 0 : index
    %c0_49 = arith.constant 0 : index
    %112 = vector.load %arg7[%c0_47, %c0_48, %c0_49] : memref<1x1x32xf32, #tpu.memory_space<vmem>>, vector<1x1x32xf32>
    %113 = vector.shape_cast %112 : vector<1x1x32xf32> to vector<1x32xf32>
    %c0_50 = arith.constant 0 : index
    %c0_51 = arith.constant 0 : index
    %c0_52 = arith.constant 0 : index
    %114 = vector.load %arg8[%c0_50, %c0_51, %c0_52] : memref<1x1x32xf32, #tpu.memory_space<vmem>>, vector<1x1x32xf32>
    %115 = vector.shape_cast %114 : vector<1x1x32xf32> to vector<1x32xf32>
    %cst_53 = arith.constant dense<0.000000e+00> : vector<16xf32>
    %116 = vector.multi_reduction <add>, %111, %cst_53 [1] : vector<16x32xf32> to vector<16xf32>
    %117 = vector.shape_cast %116 : vector<16xf32> to vector<16x1xf32>
    %cst_54 = arith.constant 3.200000e+01 : f32
    %118 = vector.broadcast %cst_54 : f32 to vector<16x1xf32>
    %119 = arith.divf %117, %118 : vector<16x1xf32>
    %120 = vector.broadcast %119 : vector<16x1xf32> to vector<16x32xf32>
    %121 = arith.subf %111, %120 : vector<16x32xf32>
    %122 = arith.mulf %121, %121 : vector<16x32xf32>
    %cst_55 = arith.constant dense<0.000000e+00> : vector<16xf32>
    %123 = vector.multi_reduction <add>, %122, %cst_55 [1] : vector<16x32xf32> to vector<16xf32>
    %124 = vector.shape_cast %123 : vector<16xf32> to vector<16x1xf32>
    %cst_56 = arith.constant 3.200000e+01 : f32
    %125 = vector.broadcast %cst_56 : f32 to vector<16x1xf32>
    %126 = arith.divf %124, %125 : vector<16x1xf32>
    %127 = vector.broadcast %119 : vector<16x1xf32> to vector<16x32xf32>
    %128 = arith.subf %111, %127 : vector<16x32xf32>
    %cst_57 = arith.constant 9.99999974E-6 : f32
    %129 = vector.broadcast %cst_57 : f32 to vector<16x1xf32>
    %130 = arith.addf %126, %129 : vector<16x1xf32>
    %131 = math.rsqrt %130 : vector<16x1xf32>
    %132 = vector.broadcast %131 : vector<16x1xf32> to vector<16x32xf32>
    %133 = arith.mulf %128, %132 : vector<16x32xf32>
    %134 = vector.broadcast %113 : vector<1x32xf32> to vector<16x32xf32>
    %135 = arith.mulf %133, %134 : vector<16x32xf32>
    %136 = vector.broadcast %115 : vector<1x32xf32> to vector<16x32xf32>
    %137 = arith.addf %135, %136 : vector<16x32xf32>
    %138 = arith.truncf %137 : vector<16x32xf32> to vector<16x32xbf16>
    %c0_58 = arith.constant 0 : index
    %c0_59 = arith.constant 0 : index
    %c0_60 = arith.constant 0 : index
    %139 = vector.load %arg9[%c0_58, %c0_59, %c0_60] : memref<1x32x2048xbf16, #tpu.memory_space<vmem>>, vector<1x32x2048xbf16>
    %140 = vector.shape_cast %139 : vector<1x32x2048xbf16> to vector<32x2048xbf16>
    %cst_61 = arith.constant dense<0.000000e+00> : vector<16x2048xf32>
    %141 = tpu.matmul %138, %140, %cst_61 {dimension_numbers = #tpu.dot_dimension_numbers<[1], [0], [0], [1], [0, 0, 1, 1], [], []>} : vector<16x32xbf16>, vector<32x2048xbf16>, vector<16x2048xf32> -> vector<16x2048xf32>
    %c0_62 = arith.constant 0 : index
    %c0_63 = arith.constant 0 : index
    %c0_64 = arith.constant 0 : index
    %142 = vector.load %arg10[%c0_62, %c0_63, %c0_64] : memref<1x1x2048xf32, #tpu.memory_space<vmem>>, vector<1x1x2048xf32>
    %143 = vector.shape_cast %142 : vector<1x1x2048xf32> to vector<1x2048xf32>
    %144 = vector.broadcast %143 : vector<1x2048xf32> to vector<16x2048xf32>
    %145 = arith.addf %141, %144 : vector<16x2048xf32>
    %cst_65 = arith.constant 0.000000e+00 : f32
    %146 = vector.broadcast %cst_65 : f32 to vector<16x2048xf32>
    %147 = arith.maximumf %145, %146 : vector<16x2048xf32>
    %148 = arith.truncf %147 : vector<16x2048xf32> to vector<16x2048xbf16>
    %c0_66 = arith.constant 0 : index
    %c0_67 = arith.constant 0 : index
    %c0_68 = arith.constant 0 : index
    %149 = vector.load %arg11[%c0_66, %c0_67, %c0_68] : memref<1x2048x32xbf16, #tpu.memory_space<vmem>>, vector<1x2048x32xbf16>
    %150 = vector.shape_cast %149 : vector<1x2048x32xbf16> to vector<2048x32xbf16>
    %cst_69 = arith.constant dense<0.000000e+00> : vector<16x32xf32>
    %151 = tpu.matmul %148, %150, %cst_69 {dimension_numbers = #tpu.dot_dimension_numbers<[1], [0], [0], [1], [0, 0, 1, 1], [], []>} : vector<16x2048xbf16>, vector<2048x32xbf16>, vector<16x32xf32> -> vector<16x32xf32>
    %c0_70 = arith.constant 0 : index
    %c0_71 = arith.constant 0 : index
    %c0_72 = arith.constant 0 : index
    %152 = vector.load %arg12[%c0_70, %c0_71, %c0_72] : memref<1x1x32xf32, #tpu.memory_space<vmem>>, vector<1x1x32xf32>
    %153 = vector.shape_cast %152 : vector<1x1x32xf32> to vector<1x32xf32>
    %154 = vector.broadcast %153 : vector<1x32xf32> to vector<16x32xf32>
    %155 = arith.addf %151, %154 : vector<16x32xf32>
    %156 = arith.addf %137, %155 : vector<16x32xf32>
    %c0_73 = arith.constant 0 : index
    %c0_74 = arith.constant 0 : index
    %c0_75 = arith.constant 0 : index
    %157 = vector.load %arg13[%c0_73, %c0_74, %c0_75] : memref<1x1x32xf32, #tpu.memory_space<vmem>>, vector<1x1x32xf32>
    %158 = vector.shape_cast %157 : vector<1x1x32xf32> to vector<1x32xf32>
    %c0_76 = arith.constant 0 : index
    %c0_77 = arith.constant 0 : index
    %c0_78 = arith.constant 0 : index
    %159 = vector.load %arg14[%c0_76, %c0_77, %c0_78] : memref<1x1x32xf32, #tpu.memory_space<vmem>>, vector<1x1x32xf32>
    %160 = vector.shape_cast %159 : vector<1x1x32xf32> to vector<1x32xf32>
    %cst_79 = arith.constant dense<0.000000e+00> : vector<16xf32>
    %161 = vector.multi_reduction <add>, %156, %cst_79 [1] : vector<16x32xf32> to vector<16xf32>
    %162 = vector.shape_cast %161 : vector<16xf32> to vector<16x1xf32>
    %cst_80 = arith.constant 3.200000e+01 : f32
    %163 = vector.broadcast %cst_80 : f32 to vector<16x1xf32>
    %164 = arith.divf %162, %163 : vector<16x1xf32>
    %165 = vector.broadcast %164 : vector<16x1xf32> to vector<16x32xf32>
    %166 = arith.subf %156, %165 : vector<16x32xf32>
    %167 = arith.mulf %166, %166 : vector<16x32xf32>
    %cst_81 = arith.constant dense<0.000000e+00> : vector<16xf32>
    %168 = vector.multi_reduction <add>, %167, %cst_81 [1] : vector<16x32xf32> to vector<16xf32>
    %169 = vector.shape_cast %168 : vector<16xf32> to vector<16x1xf32>
    %cst_82 = arith.constant 3.200000e+01 : f32
    %170 = vector.broadcast %cst_82 : f32 to vector<16x1xf32>
    %171 = arith.divf %169, %170 : vector<16x1xf32>
    %172 = vector.broadcast %164 : vector<16x1xf32> to vector<16x32xf32>
    %173 = arith.subf %156, %172 : vector<16x32xf32>
    %cst_83 = arith.constant 9.99999974E-6 : f32
    %174 = vector.broadcast %cst_83 : f32 to vector<16x1xf32>
    %175 = arith.addf %171, %174 : vector<16x1xf32>
    %176 = math.rsqrt %175 : vector<16x1xf32>
    %177 = vector.broadcast %176 : vector<16x1xf32> to vector<16x32xf32>
    %178 = arith.mulf %173, %177 : vector<16x32xf32>
    %179 = vector.broadcast %158 : vector<1x32xf32> to vector<16x32xf32>
    %180 = arith.mulf %178, %179 : vector<16x32xf32>
    %181 = vector.broadcast %160 : vector<1x32xf32> to vector<16x32xf32>
    %182 = arith.addf %180, %181 : vector<16x32xf32>
    %c0_84 = arith.constant 0 : index
    %c0_85 = arith.constant 0 : index
    %183 = vector.load %arg20[%c0_84, %c0_85] : memref<16x32xf32, #tpu.memory_space<vmem>>, vector<16x32xf32>
    tpu.vector_store %arg20[%c0_84, %c0_85], %182 {strides = array<i32>} : memref<16x32xf32, #tpu.memory_space<vmem>>, vector<16x32xf32>,
    %c1_i32 = arith.constant 1 : i32
    %184 = arith.cmpi eq, %arg1, %c1_i32 : i32
    %185 = arith.extui %184 : i1 to i32
    %c0_i32_86 = arith.constant 0 : i32
    %186 = arith.cmpi ne, %185, %c0_i32_86 : i32
    scf.if %186 {
      %187 = vector.extract_strided_slice %182 {offsets = [0, 0], sizes = [1, 32], strides = [1, 1]} : vector<16x32xf32> to vector<1x32xf32>
      %c0_87 = arith.constant 0 : index
      %c0_88 = arith.constant 0 : index
      %188 = vector.load %arg15[%c0_87, %c0_88] : memref<1x32xf32, #tpu.memory_space<vmem>>, vector<1x32xf32>
      %c0_89 = arith.constant 0 : index
      %c0_90 = arith.constant 0 : index
      %189 = vector.load %arg16[%c0_89, %c0_90] : memref<1x32xf32, #tpu.memory_space<vmem>>, vector<1x32xf32>
      %cst_91 = arith.constant dense<0.000000e+00> : vector<1xf32>
      %190 = vector.multi_reduction <add>, %187, %cst_91 [1] : vector<1x32xf32> to vector<1xf32>
      %191 = vector.shape_cast %190 : vector<1xf32> to vector<1x1xf32>
      %cst_92 = arith.constant 3.200000e+01 : f32
      %192 = vector.broadcast %cst_92 : f32 to vector<1x1xf32>
      %193 = arith.divf %191, %192 : vector<1x1xf32>
      %194 = vector.broadcast %193 : vector<1x1xf32> to vector<1x32xf32>
      %195 = arith.subf %187, %194 : vector<1x32xf32>
      %196 = arith.mulf %195, %195 : vector<1x32xf32>
      %cst_93 = arith.constant dense<0.000000e+00> : vector<1xf32>
      %197 = vector.multi_reduction <add>, %196, %cst_93 [1] : vector<1x32xf32> to vector<1xf32>
      %198 = vector.shape_cast %197 : vector<1xf32> to vector<1x1xf32>
      %cst_94 = arith.constant 3.200000e+01 : f32
      %199 = vector.broadcast %cst_94 : f32 to vector<1x1xf32>
      %200 = arith.divf %198, %199 : vector<1x1xf32>
      %201 = vector.broadcast %193 : vector<1x1xf32> to vector<1x32xf32>
      %202 = arith.subf %187, %201 : vector<1x32xf32>
      %cst_95 = arith.constant 9.99999974E-6 : f32
      %203 = vector.broadcast %cst_95 : f32 to vector<1x1xf32>
      %204 = arith.addf %200, %203 : vector<1x1xf32>
      %205 = math.rsqrt %204 : vector<1x1xf32>
      %206 = vector.broadcast %205 : vector<1x1xf32> to vector<1x32xf32>
      %207 = arith.mulf %202, %206 : vector<1x32xf32>
      %208 = arith.mulf %207, %188 : vector<1x32xf32>
      %209 = arith.addf %208, %189 : vector<1x32xf32>
      %210 = arith.truncf %209 : vector<1x32xf32> to vector<1x32xbf16>
      %c0_96 = arith.constant 0 : index
      %c0_97 = arith.constant 0 : index
      %211 = vector.load %arg17[%c0_96, %c0_97] : memref<32x2xbf16, #tpu.memory_space<vmem>>, vector<32x2xbf16>
      %cst_98 = arith.constant dense<0.000000e+00> : vector<1x2xf32>
      %212 = tpu.matmul %210, %211, %cst_98 {dimension_numbers = #tpu.dot_dimension_numbers<[1], [0], [0], [1], [0, 0, 1, 1], [], []>} : vector<1x32xbf16>, vector<32x2xbf16>, vector<1x2xf32> -> vector<1x2xf32>
      %c0_99 = arith.constant 0 : index
      %c0_100 = arith.constant 0 : index
      %213 = vector.load %arg18[%c0_99, %c0_100] : memref<1x2xf32, #tpu.memory_space<vmem>>, vector<1x2xf32>
      %214 = arith.addf %212, %213 : vector<1x2xf32>
      %c0_101 = arith.constant 0 : index
      %c0_102 = arith.constant 0 : index
      %c0_103 = arith.constant 0 : index
      %215 = vector.load %arg19[%c0_101, %c0_102, %c0_103] : memref<1x1x2xf32, #tpu.memory_space<vmem>>, vector<1x1x2xf32>
      %216 = vector.shape_cast %215 : vector<1x1x2xf32> to vector<1x2xf32>
      %217 = vector.shape_cast %214 : vector<1x2xf32> to vector<1x1x2xf32>
      tpu.vector_store %arg19[%c0_101, %c0_102, %c0_103], %217 {strides = array<i32>} : memref<1x1x2xf32, #tpu.memory_space<vmem>>, vector<1x1x2xf32>,
    } else {
    }
    return
  }
  func.func @transform_0(%arg0: i32, %arg1: i32) -> (i32, i32, i32) {
    %c0_i32 = arith.constant 0 : i32
    %c0_i32_0 = arith.constant 0 : i32
    %c0_i32_1 = arith.constant 0 : i32
    return %arg0, %c0_i32, %c0_i32_0 : i32, i32, i32
  }
  func.func @transform_1(%arg0: i32, %arg1: i32) -> (i32, i32, i32) {
    %c0_i32 = arith.constant 0 : i32
    %c0_i32_0 = arith.constant 0 : i32
    %c0_i32_1 = arith.constant 0 : i32
    return %arg1, %c0_i32, %c0_i32_0 : i32, i32, i32
  }
  func.func @transform_2(%arg0: i32, %arg1: i32) -> (i32, i32, i32) {
    %c0_i32 = arith.constant 0 : i32
    %c0_i32_0 = arith.constant 0 : i32
    %c0_i32_1 = arith.constant 0 : i32
    return %arg1, %c0_i32, %c0_i32_0 : i32, i32, i32
  }
  func.func @transform_3(%arg0: i32, %arg1: i32) -> (i32, i32, i32) {
    %c0_i32 = arith.constant 0 : i32
    %c0_i32_0 = arith.constant 0 : i32
    %c0_i32_1 = arith.constant 0 : i32
    return %arg1, %c0_i32, %c0_i32_0 : i32, i32, i32
  }
  func.func @transform_4(%arg0: i32, %arg1: i32) -> (i32, i32, i32) {
    %c0_i32 = arith.constant 0 : i32
    %c0_i32_0 = arith.constant 0 : i32
    %c0_i32_1 = arith.constant 0 : i32
    return %arg1, %c0_i32, %c0_i32_0 : i32, i32, i32
  }
  func.func @transform_5(%arg0: i32, %arg1: i32) -> (i32, i32, i32) {
    %c0_i32 = arith.constant 0 : i32
    %c0_i32_0 = arith.constant 0 : i32
    %c0_i32_1 = arith.constant 0 : i32
    return %arg1, %c0_i32, %c0_i32_0 : i32, i32, i32
  }
  func.func @transform_6(%arg0: i32, %arg1: i32) -> (i32, i32, i32) {
    %c0_i32 = arith.constant 0 : i32
    %c0_i32_0 = arith.constant 0 : i32
    %c0_i32_1 = arith.constant 0 : i32
    return %arg1, %c0_i32, %c0_i32_0 : i32, i32, i32
  }
  func.func @transform_7(%arg0: i32, %arg1: i32) -> (i32, i32, i32) {
    %c0_i32 = arith.constant 0 : i32
    %c0_i32_0 = arith.constant 0 : i32
    %c0_i32_1 = arith.constant 0 : i32
    return %arg1, %c0_i32, %c0_i32_0 : i32, i32, i32
  }
  func.func @transform_8(%arg0: i32, %arg1: i32) -> (i32, i32, i32) {
    %c0_i32 = arith.constant 0 : i32
    %c0_i32_0 = arith.constant 0 : i32
    %c0_i32_1 = arith.constant 0 : i32
    return %arg1, %c0_i32, %c0_i32_0 : i32, i32, i32
  }
  func.func @transform_9(%arg0: i32, %arg1: i32) -> (i32, i32, i32) {
    %c0_i32 = arith.constant 0 : i32
    %c0_i32_0 = arith.constant 0 : i32
    %c0_i32_1 = arith.constant 0 : i32
    return %arg1, %c0_i32, %c0_i32_0 : i32, i32, i32
  }
  func.func @transform_10(%arg0: i32, %arg1: i32) -> (i32, i32, i32) {
    %c0_i32 = arith.constant 0 : i32
    %c0_i32_0 = arith.constant 0 : i32
    %c0_i32_1 = arith.constant 0 : i32
    return %arg1, %c0_i32, %c0_i32_0 : i32, i32, i32
  }
  func.func @transform_11(%arg0: i32, %arg1: i32) -> (i32, i32, i32) {
    %c0_i32 = arith.constant 0 : i32
    %c0_i32_0 = arith.constant 0 : i32
    %c0_i32_1 = arith.constant 0 : i32
    return %arg1, %c0_i32, %c0_i32_0 : i32, i32, i32
  }
  func.func @transform_12(%arg0: i32, %arg1: i32) -> (i32, i32, i32) {
    %c0_i32 = arith.constant 0 : i32
    %c0_i32_0 = arith.constant 0 : i32
    %c0_i32_1 = arith.constant 0 : i32
    return %arg1, %c0_i32, %c0_i32_0 : i32, i32, i32
  }
  func.func @transform_13(%arg0: i32, %arg1: i32) -> (i32, i32) {
    %c0_i32 = arith.constant 0 : i32
    %c0_i32_0 = arith.constant 0 : i32
    %c0_i32_1 = arith.constant 0 : i32
    return %c0_i32, %c0_i32_0 : i32, i32
  }
  func.func @transform_14(%arg0: i32, %arg1: i32) -> (i32, i32) {
    %c0_i32 = arith.constant 0 : i32
    %c0_i32_0 = arith.constant 0 : i32
    %c0_i32_1 = arith.constant 0 : i32
    return %c0_i32, %c0_i32_0 : i32, i32
  }
  func.func @transform_15(%arg0: i32, %arg1: i32) -> (i32, i32) {
    %c0_i32 = arith.constant 0 : i32
    %c0_i32_0 = arith.constant 0 : i32
    %c0_i32_1 = arith.constant 0 : i32
    return %c0_i32, %c0_i32_0 : i32, i32
  }
  func.func @transform_16(%arg0: i32, %arg1: i32) -> (i32, i32) {
    %c0_i32 = arith.constant 0 : i32
    %c0_i32_0 = arith.constant 0 : i32
    %c0_i32_1 = arith.constant 0 : i32
    return %c0_i32, %c0_i32_0 : i32, i32
  }
  func.func @transform_17(%arg0: i32, %arg1: i32) -> (i32, i32, i32) {
    %c0_i32 = arith.constant 0 : i32
    %c0_i32_0 = arith.constant 0 : i32
    %c0_i32_1 = arith.constant 0 : i32
    return %arg0, %c0_i32, %c0_i32_0 : i32, i32, i32
  }
}

</mosaic_0001>

<bundles_post_ra>
// kernel: tpu_custom_call.1
= control target key start
LH: loop header
LB: loop body
LE: loop exit
PB: predicated region body
PF: predicated region fallthrough
CT: control target
= control target key end

     0   :  { %s6028_s0 = inlined_call_operand.vmem [shape: f32[2,16,32], index: 0, kind: input, shape index: {}]   ;;  %s6029_s1 = inlined_call_operand.vmem [shape: bf16[2,32,96], index: 1, kind: input, shape index: {}]   ;;  %s6030_s2 = inlined_call_operand.vmem [shape: f32[2,1,96], index: 2, kind: input, shape index: {}]   ;;  %s6031_s3 = inlined_call_operand.vmem [shape: bf16[2,32,32], index: 3, kind: input, shape index: {}]   ;;  %s6032_s4 = inlined_call_operand.vmem [shape: f32[2,1,32], index: 4, kind: input, shape index: {}]   ;;  %s6033_s5 = inlined_call_operand.vmem [shape: f32[2,1,32], index: 5, kind: input, shape index: {}]   ;;  %s6034_s6 = inlined_call_operand.vmem [shape: f32[2,1,32], index: 6, kind: input, shape index: {}]   ;;  %s6035_s7 = inlined_call_operand.vmem [shape: bf16[2,32,2048], index: 7, kind: input, shape index: {}]   ;;  %s6036_s8 = inlined_call_operand.vmem [shape: f32[2,1,2048], index: 8, kind: input, shape index: {}]   ;;  %s6037_s9 = inlined_call_operand.vmem [shape: bf16[2,2048,32], index: 9, kind: input, shape index: {}]   ;;  %s6038_s10 = inlined_call_operand.vmem [shape: f32[2,1,32], index: 10, kind: input, shape index: {}]   ;;  %s6039_s11 = inlined_call_operand.vmem [shape: f32[2,1,32], index: 11, kind: input, shape index: {}]   ;;  %s6040_s12 = inlined_call_operand.vmem [shape: f32[2,1,32], index: 12, kind: input, shape index: {}]   ;;  %s6041_s13 = inlined_call_operand.vmem [shape: f32[1,32], index: 13, kind: input, shape index: {}]   ;;  %s6042_s14 = inlined_call_operand.vmem [shape: f32[1,32], index: 14, kind: input, shape index: {}]   ;;  %s6043_s15 = inlined_call_operand.vmem [shape: bf16[32,2], index: 15, kind: input, shape index: {}]   ;;  %s6044_s16 = inlined_call_operand.vmem [shape: f32[1,2], index: 16, kind: input, shape index: {}]   ;;  %s6045_s17 = inlined_call_operand.hbm [shape: f32[2,1,2], index: 17, kind: output, shape index: {}]  }
   0x1   :  { %6060 = sst [smem:[#allocation18_spill]] %s6028_s0 }
   0x2   :  { %6061 = sst [smem:[#allocation19_spill]] %s6029_s1 }
   0x3   :  { %6062 = sst [smem:[#allocation20_spill]] %s6031_s3 }
   0x4   :  { %6063 = sst [smem:[#allocation21_spill]] %s6035_s7 }
   0x5   :  { %6064 = sst [smem:[#allocation22_spill]] %s6036_s8 }
   0x6   :  { %6065 = sst [smem:[#allocation23_spill]] %s6040_s12 }
   0x7   :  { %6066 = sst [smem:[#allocation24_spill]] %s6041_s13 }
   0x8   :  { %6067 = sst [smem:[#allocation25_spill]] %s6042_s14 }
   0x9   :  { %6068 = sst [smem:[#allocation26_spill]] %s6043_s15 }
   0xa   :  { %6069 = sst [smem:[#allocation27_spill]] %s6044_s16 }
   0xb   :  { %6070 = sst [smem:[#allocation28_spill]] %s6045_s17 }
   0xc   :  { %22 = vsyncpa [#allocation4], 0 }
   0xd   :  { %24 = vsyncpa [#allocation4 + $0x1], 0  ;;  %s5378_s24 = smov 0   ;;  %s5380_s25 = smov 0  }
   0xe   :  { %s5382_s26 = smov 0   ;;  %s5384_s27 = smov 0  }
   0xf   :  { %s5386_s28 = smov 0   ;;  %s5388_s29 = smov 0  }
  0x10   :  { %s5390_s0 = smov 0   ;;  %s5392_s30 = smov 0  }
  0x11 LB: > { %6071 = sst [smem:[#allocation6_spill]] %s5240_s24  ;;  %s4277_s18 = sadd.s32 4294967295, %s5268_s30   ;;  %s5268_s30 = sphi %s5392_s30, %s30_s30   ;;  %s5264_s0 = sphi %s5390_s0, %s6117_s0   ;;  %s5260_s29 = sphi %s5388_s29, %s6120_s29   ;;  %s5256_s28 = sphi %s5386_s28, %s6115_s28   ;;  %s5252_s27 = sphi %s5384_s27, %s6114_s27   ;;  %s5248_s26 = sphi %s5382_s26, %s6113_s26   ;;  %s5244_s25 = sphi %s5380_s25, %s6119_s25   ;;  %s5240_s24 = sphi %s5378_s24, %s6118_s24  }
  0x12   : > { %6072 = sst [smem:[#allocation7_spill]] %s5248_s26  ;;  %s4278_s19 = sadd.s32 4294967294, %s5268_s30  }
  0x13   : > { %6073 = sst [smem:[#allocation8_spill]] %s5252_s27  ;;  %s39_s1 = sadd.s32 1, %s5260_s29 }
  0x14   : > { %6074 = sst [smem:[#allocation9_spill]] %s5256_s28  ;;  %p40_p0 = scmp.ge.s32.totalorder %s39_s1, 2 }
  0x15   : > { %6075 = sst [smem:[#allocation10_spill]] %s5260_s29  ;;  %s42_s20 = sadd.s32 1, %s5264_s0 }
  0x16   : > { %6076 = sst [smem:[#allocation11_spill]] %s5264_s0  ;;  %p481_p1 = scmp.ne.s32.totalorder %s5248_s26, %s5244_s25 }
  0x17   : > { %6077 = sst [smem:[#allocation12_spill]] %s5268_s30  ;;  %p482_p2 = scmp.eq.s32.totalorder %s4277_s18, 3 }
  0x18   : > { %s6122_s1 = smov (%p40_p0, %s39_s1), 0  ;;  %s6124_s20 = smov (!%p40_p0, %s42_s20), %s5264_s0 }
  0x19   : > { %6078 = sst [smem:[#allocation13_spill]] %s6122_s1  ;;  %p5427_p3 = por %p482_p2, %p481_p1 }
  0x1a   : > { %p487_p4 = scmp.ne.s32.totalorder %s5244_s25, %s5240_s24  ;;  %p44_p5 = scmp.ge.s32.totalorder %s6124_s20, 2 }
  0x1b   : > { %s6079_s21 = scalar_select %p5427_p3, 1, 0 }
  0x1c   : > { %p488_p6 = scmp.eq.s32.totalorder %s4278_s19, 3  ;;  %p4281_p7 = scmp.ge.s32.totalorder %s5268_s30, 1 }
  0x1d   : > { %6080 = sst [smem:[#allocation14_spill]] %s6079_s21  ;;  %p607_p8 = scmp.lt.s32.totalorder %s5268_s30, 5 }
  0x1e   : > { %s6126_s20 = smov (%p44_p5, %s6124_s20), 0  ;;  %p5437_p9 = por %p488_p6, %p487_p4 }
  0x1f   : > { %6081 = sst [smem:[#allocation15_spill]] %s6126_s20  ;;  %p608_p10 = pnand %p4281_p7, %p607_p8 }
  0x20   : > { %s6082_s22 = scalar_select %p5437_p9, 1, 0 }
  0x21   : > { %s468_s23 = ssub.s32 %s5264_s0, %s6126_s20  ;;  %s471_s18 = sadd.s32 1, %s5248_s26 }
  0x22   : > { %6083 = sst [smem:[#allocation16_spill]] %s6082_s22  ;;  %p469_p11 = scmp.eq.s32.totalorder %s468_s23, 0 }
  0x23   : > { %611 = sbr.rel (%p608_p10) target bundleno = 4418 (0x1142), region = 88  ;;  %p703_p12 = scmp.lt.s32.totalorder (!%p608_p10), %s5256_s28, 1 }
  0x24   : > { %s5445_s1 = scalar_select %p469_p11, %s5248_s26, %s471_s18  }
  0x25   : > { %p708_p13 = scmp.lt.s32.totalorder (!%p608_p10), %s5252_s27, 1  ;;  %s6085_s0 = sld [smem:[#allocation18_spill]] (!%p608_p10) }
  0x26   : > { %6084 = sst [smem:[#allocation17_spill]] %s5445_s1  ;;  %s6086_s30 = sld [smem:[#allocation19_spill]] (!%p608_p10) }
  0x27   : > { %s6087_s3 = sld [smem:[#allocation20_spill]] (!%p608_p10)  ;;  %s6088_s8 = sld [smem:[#allocation22_spill]] (!%p608_p10) }
  0x28   : > { %s6089_s7 = sld [smem:[#allocation21_spill]] (!%p608_p10) }
  0x2a   : > { %s704_s29 = scalar_select %p703_p12, %s5256_s28, 1 }
  0x2b   : > { %s5452_s24 = scalar_select %p708_p13, %s5252_s27, 1 }
  0x2c   : > { %s4507_s23 = sshll.u32 %s704_s29, 4 }
  0x2d   : > { %s707_s19 = scalar_lea.vmem %s6085_s0, %s4507_s23  ;;  %s4508_s1 = sshll.u32 %s5452_s24, 4 }
  0x2e   : > { %s712_s17 = scalar_lea.vmem %s6086_s30, %s4508_s1  ;;  %s5468_s15 = scalar_lea.vmem %s6087_s3, %s4508_s1 }
  0x2f   : > { %s4510_s22 = sshll.u32 %s5452_s24, 8  ;;  %s5486_s16 = scalar_lea.vmem %s6088_s8, %s4508_s1 }
  0x30   : > { %s5491_s3 = scalar_lea.vmem %s6089_s7, %s4510_s22  ;;  %s4511_s27 = sshll.u32 %s5452_s24, 10 }
  0x31   : > { %s5497_s0 = scalar_lea.vmem %s6037_s9, %s4511_s27  ;;  %s746_s26 = scalar_lea.vmem %s6038_s10, %s5452_s24 }
  0x32   : > { %s749_s1 = scalar_lea.vmem %s6039_s11, %s5452_s24  ;;  %s6090_s8 = sld [smem:[#allocation23_spill]] }
  0x33   : > { %s6091_s22 = sand.u32 1, %s5244_s25   ;;  %s6092_s7 = sld [smem:[#allocation8_spill]] }
  0x34   : > { %s5513_s14 = scalar_lea.vmem [#allocation3], %s6091_s22 }
  0x38   : > { %s752_s13 = scalar_lea.vmem %s6090_s8, %s5452_s24 }
  0x39   : > { %p4293_p0 = scmp.ne.s32.totalorder %s6092_s7, 0 }
  0x3a   : > { %v758_v0 = vld [vmem:[%s707_s19] sm:$0xff] (!%p4293_p0)  ;;  %vm760_vm0 = vcmask (!%p4293_p0), 261120   ;;  %v759_v1 = vld [vmem:[%s707_s19 + $0x8] sm:$0xff] (!%p4293_p0) }
  0x3b   : > { %757 = sbr.rel (%p4293_p0) target bundleno = 66 (0x42), region = 92  ;;  %761 = vst.msk [vmem:[#allocation2] sm:$0xff] (!%p4293_p0), %vm760_vm0, %v758_v0  ;;  %762 = vst.msk [vmem:[#allocation2 + $0x8] sm:$0xff] (!%p4293_p0), %vm760_vm0, %v759_v1 }
  0x42 PF: > { %v4998_v2 = vld [vmem:[%s712_s17] sm:$0xff]   ;;  %v5270_v3 = vmov 0.0   ;;  %v4999_v4 = vld [vmem:[%s712_s17 + $0x8] sm:$0xff]   ;;  %vm5271_vm1 = vmmov 0   ;;  %vm793_vm2 = vcmask 261120   ;;  %s6093_s19 = scalar_lea.vmem %s6030_s2, %s5452_s24  ;;  %vm844_vm3 = vcmask 64512  }
  0x43   : > { %4734 = vmatprep.subr.bf16.mxu0 %v5270_v3  ;;  %4738 = vmatprep.mubr.msk.bf16.mxu0 %vm5271_vm1, %v5270_v3  ;;  %v763_v5 = vld [vmem:[#allocation2] sm:$0xff]  ;;  %v764_v6 = vld [vmem:[#allocation2 + $0x8] sm:$0xff]  ;;  %s5272_s17 = smov 120   ;;  %s5273_s20 = smov 96   ;;  %vm5543_vm4 = vmpackc.low %vm844_vm3, %vm844_vm3  ;;  %v766_v27 = vlaneseq  ;;  %v5275_v30 = vmov -1e+30  }
  0x44   : > { %4735 = vmatpush3.bf16.msra.mxu0 %v4998_v2  ;;  %v765_v7 = vpack.c.bf16 %v764_v6, %v763_v5  ;;  %v4294_v8 = vld [vmem:[%s6093_s19] ss:$0 sm:$0xff]  ;;  %s5274_s18 = smov 88   ;;  %vm932_vm6 = vcmask 130048   ;;  %s5276_s30 = smov 64   ;;  %vm1253_vm7 = vcmask 1043456  }
  0x45   : > { %4736 = vmatprep.subr.bf16.mxu0 %v5270_v3  ;;  %v767_v28 = vand.u32 127, %v766_v27  ;;  %s5277_s27 = smov 80   ;;  %s5278_s29 = smov 112  }
  0x46   : > { %s5279_s23 = smov 56   ;;  %s5280_s12 = smov 72  }
  0x47   : > { %vm768_vm5 = vcmp.lt.s32.totalorder %v767_v28, 9  ;;  %s5281_s28 = smov 104   ;;  %s5282_s21 = smov 48  }
  0x48   : > { %4737 = vmatpush3.bf16.msra.mxu0 %v4999_v4  ;;  %v5562_v31 = vsel %vm768_vm5, 0.0, %v5275_v30  ;;  %v1249_v4 = vld [vmem:[%s5468_s15 + $0x4] sm:$0xf]  ;;  %s5283_s22 = smov 40   ;;  %s6096_s19 = scalar_lea.vmem %s6032_s4, %s5452_s24 }
  0x49   : > { %v1255_v5 = vsel %vm1253_vm7, %v1249_v4, 0 }
  0x4b   : > { %4739 = vmatmul.mubr.msk.bf16.vlgmr.msra.gmra.mrb[0].mxu0 %vm793_vm2, %v765_v7 }
 0x11e   : > { %v831_v9 = vpop.f32.mrb[0].mxu0 }
 0x11f   : > { %v5526_v10 = vadd.f32 %v4294_v8, %v831_v9  ;;  %v4740_v11 = vpop.f32.mrb[1].mxu0 }
 0x120   : > { %v834_v12 = vpop.f32.mrb[2].mxu0 }
 0x121   : > { %v5528_v13 = vadd.f32 %v4294_v8, %v834_v12  ;;  %1044 = vrot.lane.b32.xlu1 %v5526_v10, %s5272_s17  ;;  %v4741_v14 = vpop.f32.mrb[3].mxu0  ;;  %4746 = vmatprep.mubr.msk.f32.mxu1 %vm844_vm3, %v5526_v10 }
 0x123   : > { %v5535_v15 = vpack.i.bf16 %v5528_v13, %v5526_v10 }
 0x125   : > { %1046 = vrot.lane.b32.xlu1 %v5528_v13, %s5272_s17  ;;  %4959 = vrot.lane.b32.xlu0 %v5535_v15, %s5273_s20  ;;  %s6097_s20 = scalar_lea.vmem %s6033_s5, %s5452_s24 }
 0x129   : > { %4964 = vrot.lane.b32.xlu0 %v5535_v15, %s5274_s18 }
 0x193   : > { %v1045_v16 = vpop.permute.xlu1 %1044 }
 0x194   : > { %4760 = vmatprep.mubr.msk.f32.mxu0 %vm844_vm3, %v1045_v16 }
 0x197   : > { %v4960_v17 = vpop.permute.xlu0 %4959  ;;  %v1047_v26 = vpop.permute.xlu1 %1046 }
 0x198   : > { %v4962_v18 = vunpack.i.h.bf16 %v4960_v17  ;;  %v4961_v19 = vunpack.i.l.bf16 %v4960_v17 }
 0x19a   : > { %v4830_v21 = vpack.c.bf16 %v4962_v18, %v4961_v19 }
 0x19b   : > { %v4965_v22 = vpop.permute.xlu0 %4964 }
 0x19c   : > { %v4967_v23 = vunpack.i.h.bf16 %v4965_v22  ;;  %v4966_v24 = vunpack.i.l.bf16 %v4965_v22  ;;  %4832 = vmatprep.subr.msk.bf16.mxu1 %vm5543_vm4, %v4830_v21 }
 0x19d   : > { %4835 = vmatpush3.bf16.xpose.msk.msra.mxu1 %vm5543_vm4, %v4830_v21 }
 0x19e   : > { %v4840_v25 = vpack.c.bf16 %v4967_v23, %v4966_v24 }
 0x1a0   : > { %4842 = vmatprep.subr.msk.bf16.mxu0 %vm5543_vm4, %v4840_v25 }
 0x1a1   : > { %4845 = vmatpush3.bf16.xpose.msk.msra.mxu0 %vm5543_vm4, %v4840_v25 }
 0x1a2   : > { %4770 = vmatprep.subr.bf16.mxu0 %v5270_v3 }
 0x1a4   : > { %4747 = vmatmul.mubr.msk.f32.vlgmr.msra.gmra.mrb[0].mxu1 %vm844_vm3, %v5528_v13 }
 0x1a8   : > { %4761 = vmatmul.mubr.msk.f32.vlgmr.msra.gmra.mrb[4].mxu0 %vm844_vm3, %v1047_v26 }
 0x1a9   : > { %4772 = vmatprep.mubr.msk.bf16.mxu0 %vm5271_vm1, %v5270_v3  ;;  %4771 = vmatpush3.bf16.msra.mxu0 %v1255_v5 }
 0x277   : > { %v4748_v29 = vpop.f32.mrb[0].mxu1 }
 0x278   : > { %v929_v32 = vmul.f32 0.35355338, %v4748_v29  ;;  %v919_v33 = vpop.f32.mrb[1].mxu1 }
 0x279   : > { %v928_v34 = vmul.f32 0.35355338, %v919_v33 }
 0x27a   : > { %v931_v35 = vadd.f32 %v929_v32, %v5562_v31 }
 0x27b   : > { %v4762_v36 = vpop.f32.mrb[4].mxu0  ;;  %v930_v37 = vadd.f32 %v928_v34, %v5562_v31 }
 0x27c   : > { %v1126_v38 = vpop.f32.mrb[5].mxu0  ;;  %v936_v39 = vsel %vm932_vm6, %v931_v35, -inf  ;;  %v1136_v40 = vmul.f32 0.35355338, %v4762_v36  ;;  %v1043_v36 = vld [vmem:[%s5468_s15] sm:$0xf] }
 0x27d   : > { %v1135_v41 = vmul.f32 0.35355338, %v1126_v38  ;;  %937 = vmax.xlane.f32.xlu1 %v936_v39  ;;  %v933_v42 = vsel %vm932_vm6, %v930_v37, -inf }
 0x27e   : > { %934 = vmax.xlane.f32.xlu0 %v933_v42  ;;  %v1138_v45 = vadd.f32 %v1136_v40, %v5562_v31 }
 0x27f   : > { %v1137_v43 = vadd.f32 %v1135_v41, %v5562_v31 }
 0x280   : > { %v1142_v46 = vsel %vm932_vm6, %v1138_v45, -inf }
 0x281   : > { %v1139_v44 = vsel %vm932_vm6, %v1137_v43, -inf }
 0x282   : > { %1140 = vmax.xlane.f32.xlu0 %v1139_v44 }
 0x286   : > { %1143 = vmax.xlane.f32.xlu0 %v1142_v46 }
 0x30a   : > { %v938_v47 = vpop.xlane.xlu1 %937 }
 0x30b   : > { %v940_v48 = vsub.f32 %v931_v35, %v938_v47  ;;  %v935_v49 = vpop.xlane.xlu0 %934 }
 0x30c   : > { %v939_v50 = vsub.f32 %v930_v37, %v935_v49  ;;  %v1302_v37 = vsel %vm1253_vm7, %v1043_v36, 0 }
 0x30d   : > { %v943_v51 = vmul.f32 1.442695, %v940_v48 }
 0x30e   : > { %v941_v52 = vmul.f32 1.442695, %v939_v50 }
 0x30f   : > { %5128 = vpow2.f32 %v943_v51  ;;  %v1141_v53 = vpop.xlane.xlu0 %1140 }
 0x310   : > { %5130 = vpow2.f32 %v941_v52  ;;  %v1145_v54 = vsub.f32 %v1137_v43, %v1141_v53 }
 0x312   : > { %v1147_v55 = vmul.f32 1.442695, %v1145_v54 }
 0x313   : > { %v1144_v56 = vpop.xlane.xlu0 %1143 }
 0x314   : > { %5132 = vpow2.f32 %v1147_v55  ;;  %v1146_v57 = vsub.f32 %v1138_v45, %v1144_v56 }
 0x316   : > { %v1149_v58 = vmul.f32 1.442695, %v1146_v57 }
 0x318   : > { %5134 = vpow2.f32 %v1149_v58 }
 0x319   : > { %v5129_v59 = vpop.eup %5128 }
 0x31a   : > { %v5131_v60 = vpop.eup %5130  ;;  %v948_v61 = vsel %vm932_vm6, %v5129_v59, 0.0 }
 0x31b   : > { %949 = vadd.xlane.f32.xlu0 %v948_v61  ;;  %v945_v62 = vsel %vm932_vm6, %v5131_v60, 0.0 }
 0x31c   : > { %946 = vadd.xlane.f32.xlu1 %v945_v62 }
 0x31e   : > { %v5133_v63 = vpop.eup %5132 }
 0x31f   : > { %v1151_v0 = vsel %vm932_vm6, %v5133_v63, 0.0 }
 0x320   : > { %1152 = vadd.xlane.f32.xlu1 %v1151_v0 }
 0x322   : > { %v5135_v1 = vpop.eup %5134 }
 0x323   : > { %v1154_v2 = vsel %vm932_vm6, %v5135_v1, 0.0 }
 0x324   : > { %1155 = vadd.xlane.f32.xlu0 %v1154_v2 }
 0x331   : > { %4969 = vrot.lane.b32.xlu1 %v5535_v15, %s5276_s30 }
 0x335   : > { %4979 = vrot.lane.b32.xlu1 %v5535_v15, %s5277_s27  ;;  %s6098_s27 = scalar_lea.vmem %s6034_s6, %s5452_s24 }
 0x339   : > { %1345 = vrot.lane.b32.xlu1 %v5526_v10, %s5278_s29 }
 0x33a   : > { %4974 = vrot.lane.b32.xlu0 %v5535_v15, %s5279_s23 }
 0x33e   : > { %1347 = vrot.lane.b32.xlu0 %v5528_v13, %s5278_s29 }
 0x3a8   : > { %v950_v6 = vpop.xlane.xlu0 %949 }
 0x3a9   : > { %v947_v7 = vpop.xlane.xlu1 %946 }
 0x3aa   : > { %5136 = vrcp.f32 %v947_v7 }
 0x3ab   : > { %5138 = vrcp.f32 %v950_v6 }
 0x3ad   : > { %v1153_v8 = vpop.xlane.xlu1 %1152 }
 0x3ae   : > { %5140 = vrcp.f32 %v1153_v8 }
 0x3b1   : > { %v4970_v9 = vpop.permute.xlu1 %4969  ;;  %v1156_v11 = vpop.xlane.xlu0 %1155 }
 0x3b2   : > { %v4972_v12 = vunpack.i.h.bf16 %v4970_v9  ;;  %v4971_v14 = vunpack.i.l.bf16 %v4970_v9  ;;  %5142 = vrcp.f32 %v1156_v11 }
 0x3b4   : > { %v5137_v16 = vpop.eup %5136  ;;  %v4836_v17 = vpack.c.bf16 %v4972_v12, %v4971_v14 }
 0x3b5   : > { %v5139_v18 = vpop.eup %5138  ;;  %v4980_v19 = vpop.permute.xlu1 %4979  ;;  %v952_v22 = vmul.f32 %v5137_v16, %v5131_v60 }
 0x3b6   : > { %v4975_v21 = vpop.permute.xlu0 %4974  ;;  %v4982_v23 = vunpack.i.h.bf16 %v4980_v19  ;;  %v4981_v24 = vunpack.i.l.bf16 %v4980_v19  ;;  %4837 = vmatprep.subr.bf16.mxu1 %v4836_v17  ;;  %v954_v29 = vmul.f32 %v5139_v18, %v5129_v59 }
 0x3b7   : > { %v4977_v25 = vunpack.i.h.bf16 %v4975_v21  ;;  %v4976_v26 = vunpack.i.l.bf16 %v4975_v21  ;;  %4839 = vmatpush3.bf16.msra.mxu1 %v4836_v17  ;;  %4753 = vmatprep.mubr.msk.f32.mxu1 %vm932_vm6, %v952_v22 }
 0x3b8   : > { %v5141_v28 = vpop.eup %5140  ;;  %v4850_v30 = vpack.c.bf16 %v4982_v23, %v4981_v24 }
 0x3b9   : > { %v4846_v32 = vpack.c.bf16 %v4977_v25, %v4976_v26  ;;  %v1158_v33 = vmul.f32 %v5141_v28, %v5133_v63  ;;  %v1346_v44 = vpop.permute.xlu1 %1345 }
 0x3ba   : > { %4754 = vmatmul.mubr.msk.f32.vlgmr.msra.gmra.mrb[2].mxu1 %vm932_vm6, %v954_v29  ;;  %4852 = vmatprep.subr.msk.bf16.mxu0 %vm5543_vm4, %v4850_v30  ;;  %v1348_v45 = vpop.permute.xlu0 %1347 }
 0x3bb   : > { %4847 = vmatprep.subr.bf16.mxu1 %v4846_v32  ;;  %4767 = vmatprep.mubr.msk.f32.mxu1 %vm932_vm6, %v1158_v33 }
 0x3bc   : > { %4849 = vmatpush3.bf16.msra.mxu1 %v4846_v32  ;;  %v5143_v34 = vpop.eup %5142 }
 0x3bd   : > { %4776 = vmatprep.subr.bf16.mxu1 %v5270_v3  ;;  %v1160_v35 = vmul.f32 %v5143_v34, %v5135_v1 }
 0x3bf   : > { %4768 = vmatmul.mubr.msk.f32.vlgmr.msra.gmra.mrb[4].mxu1 %vm932_vm6, %v1160_v35 }
 0x3c0   : > { %4778 = vmatprep.mubr.msk.bf16.mxu1 %vm5271_vm1, %v5270_v3  ;;  %4777 = vmatpush3.bf16.msra.mxu1 %v1302_v37 }
 0x48d   : > { %v4755_v38 = vpop.f32.mrb[2].mxu1 }
 0x48e   : > { %v1033_v39 = vpop.f32.mrb[3].mxu1 }
 0x48f   : > { %v1042_v40 = vpack.c.bf16 %v4755_v38, %v1033_v39 }
 0x491   : > { %4779 = vmatmul.mubr.msk.bf16.vlgmr.msra.gmra.mrb[8].mxu1 %vm844_vm3, %v1042_v40 }
 0x492   : > { %v4769_v41 = vpop.f32.mrb[4].mxu1 }
 0x493   : > { %v1239_v42 = vpop.f32.mrb[5].mxu1 }
 0x494   : > { %v1248_v43 = vpack.c.bf16 %v4769_v41, %v1239_v42 }
 0x496   : > { %4773 = vmatmul.mubr.msk.bf16.vlgmr.msra.gmra.mrb[8].mxu0 %vm844_vm3, %v1248_v43 }
 0x497   : > { %4855 = vmatpush3.bf16.xpose.msk.msra.mxu0 %vm5543_vm4, %v4850_v30  ;;  %4786 = vmatprep.mubr.msk.f32.mxu0 %vm844_vm3, %v1346_v44  ;;  %v1550_v30 = vld [vmem:[%s5468_s15 + $0x8] sm:$0xf] }
 0x498   : > { %4796 = vmatprep.subr.bf16.mxu0 %v5270_v3  ;;  %v1555_v32 = vsel %vm1253_vm7, %v1550_v30, 0 }
 0x49e   : > { %4787 = vmatmul.mubr.msk.f32.vlgmr.msra.gmra.mrb[6].mxu0 %vm844_vm3, %v1348_v45 }
 0x49f   : > { %4798 = vmatprep.mubr.msk.bf16.mxu0 %vm5271_vm1, %v5270_v3  ;;  %4797 = vmatpush3.bf16.msra.mxu0 %v1555_v32 }
 0x564   : > { %v1338_v46 = vpop.f32.mrb[8].mxu1 }
 0x565   : > { %v4780_v47 = vpop.f32.mrb[9].mxu1 }
 0x566   : > { %v1341_v48 = vpop.f32.mrb[10].mxu1 }
 0x567   : > { %v4781_v49 = vpop.f32.mrb[11].mxu1 }
 0x569   : > { %v1291_v50 = vpop.f32.mrb[8].mxu0 }
 0x56a   : > { %v5603_v51 = vadd.f32 %v1338_v46, %v1291_v50  ;;  %v4774_v52 = vpop.f32.mrb[9].mxu0 }
 0x56b   : > { %v1294_v53 = vpop.f32.mrb[10].mxu0 }
 0x56c   : > { %v5605_v54 = vadd.f32 %v1341_v48, %v1294_v53  ;;  %v4775_v55 = vpop.f32.mrb[11].mxu0 }
 0x571   : > { %v4788_v56 = vpop.f32.mrb[6].mxu0 }
 0x572   : > { %v1437_v57 = vmul.f32 0.35355338, %v4788_v56  ;;  %v1427_v58 = vpop.f32.mrb[7].mxu0 }
 0x573   : > { %v1436_v59 = vmul.f32 0.35355338, %v1427_v58 }
 0x574   : > { %v1439_v60 = vadd.f32 %v1437_v57, %v5562_v31 }
 0x575   : > { %v1438_v61 = vadd.f32 %v1436_v59, %v5562_v31 }
 0x576   : > { %v1443_v62 = vsel %vm932_vm6, %v1439_v60, -inf }
 0x577   : > { %1444 = vmax.xlane.f32.xlu0 %v1443_v62  ;;  %v1440_v63 = vsel %vm932_vm6, %v1438_v61, -inf }
 0x578   : > { %1441 = vmax.xlane.f32.xlu1 %v1440_v63 }
 0x604   : > { %v1445_v0 = vpop.xlane.xlu0 %1444 }
 0x605   : > { %v1447_v1 = vsub.f32 %v1439_v60, %v1445_v0  ;;  %v1442_v2 = vpop.xlane.xlu1 %1441 }
 0x606   : > { %v1446_v4 = vsub.f32 %v1438_v61, %v1442_v2 }
 0x607   : > { %v1450_v5 = vmul.f32 1.442695, %v1447_v1 }
 0x608   : > { %v1448_v6 = vmul.f32 1.442695, %v1446_v4 }
 0x609   : > { %5144 = vpow2.f32 %v1450_v5 }
 0x60a   : > { %5146 = vpow2.f32 %v1448_v6 }
 0x613   : > { %v5145_v7 = vpop.eup %5144 }
 0x614   : > { %v5147_v8 = vpop.eup %5146  ;;  %v1455_v9 = vsel %vm932_vm6, %v5145_v7, 0.0 }
 0x615   : > { %1456 = vadd.xlane.f32.xlu1 %v1455_v9  ;;  %v1452_v11 = vsel %vm932_vm6, %v5147_v8, 0.0  ;;  %v4326_v9 = vld [vmem:[%s6096_s19] ss:$0 sm:$0xff] }
 0x616   : > { %1453 = vadd.xlane.f32.xlu0 %v1452_v11 }
 0x626   : > { %4989 = vrot.lane.b32.xlu1 %v5535_v15, %s5280_s12 }
 0x62a   : > { %1600 = vrot.lane.b32.xlu1 %v5526_v10, %s5281_s28 }
 0x62c   : > { %4984 = vrot.lane.b32.xlu0 %v5535_v15, %s5282_s21 }
 0x630   : > { %1602 = vrot.lane.b32.xlu0 %v5528_v13, %s5281_s28  ;;  %s6100_s28 = sld [smem:[#allocation8_spill]] }
 0x636   : > { %p4500_p1 = scmp.ne.s32.totalorder %s6100_s28, 1 }
 0x637   : > { %vm3996_vm8 = vcmask (!%p4500_p1), 253952   ;;  %vm5286_vm9 = vmmov (!%p4500_p1), 0   ;;  %s6102_s19 = sld [smem:[#allocation24_spill]] (!%p4500_p1)  ;;  %vm4073_vm10 = vcmask (!%p4500_p1), 8192  }
 0x6a2   : > { %v1457_v12 = vpop.xlane.xlu1 %1456 }
 0x6a3   : > { %5148 = vrcp.f32 %v1457_v12  ;;  %v1454_v14 = vpop.xlane.xlu0 %1453 }
 0x6a4   : > { %5150 = vrcp.f32 %v1454_v14 }
 0x6a6   : > { %v4990_v16 = vpop.permute.xlu1 %4989 }
 0x6a7   : > { %v4985_v17 = vpop.permute.xlu0 %4984  ;;  %v4992_v18 = vunpack.i.h.bf16 %v4990_v16  ;;  %v4991_v19 = vunpack.i.l.bf16 %v4990_v16 }
 0x6a8   : > { %v4987_v21 = vunpack.i.h.bf16 %v4985_v17  ;;  %v4986_v22 = vunpack.i.l.bf16 %v4985_v17 }
 0x6a9   : > { %v4860_v24 = vpack.c.bf16 %v4992_v18, %v4991_v19 }
 0x6aa   : > { %v4856_v23 = vpack.c.bf16 %v4987_v21, %v4986_v22  ;;  %v1601_v28 = vpop.permute.xlu1 %1600  ;;  %v5168_v21 = vld [vmem:[#allocation2] sm:$0xff] }
 0x6ab   : > { %v1603_v29 = vpop.permute.xlu0 %1602 }
 0x6ac   : > { %4857 = vmatprep.subr.bf16.mxu1 %v4856_v23 }
 0x6ad   : > { %v5149_v10 = vpop.eup %5148  ;;  %4859 = vmatpush3.bf16.msra.mxu1 %v4856_v23 }
 0x6ae   : > { %v5151_v25 = vpop.eup %5150  ;;  %4862 = vmatprep.subr.msk.bf16.mxu1 %vm5543_vm4, %v4860_v24  ;;  %v1461_v26 = vmul.f32 %v5149_v10, %v5145_v7 }
 0x6af   : > { %v1459_v13 = vmul.f32 %v5151_v25, %v5147_v8 }
 0x6b1   : > { %4793 = vmatprep.mubr.msk.f32.mxu1 %vm932_vm6, %v1459_v13 }
 0x6b2   : > { %4794 = vmatmul.mubr.msk.f32.vlgmr.msra.gmra.mrb[6].mxu1 %vm932_vm6, %v1461_v26 }
 0x6b3   : > { %4806 = vmatprep.mubr.msk.f32.mxu1 %vm844_vm3, %v1601_v28 }
 0x6b6   : > { %4865 = vmatpush3.bf16.xpose.msk.msra.mxu1 %vm5543_vm4, %v4860_v24  ;;  %v5169_v24 = vld [vmem:[#allocation2 + $0x8] sm:$0xff] }
 0x6b7   : > { %4816 = vmatprep.subr.bf16.mxu1 %v5270_v3 }
 0x6bd   : > { %4807 = vmatmul.mubr.msk.f32.vlgmr.msra.gmra.mrb[12].mxu1 %vm844_vm3, %v1603_v29 }
 0x6be   : > { %4818 = vmatprep.mubr.msk.bf16.mxu1 %vm5271_vm1, %v5270_v3 }
 0x785   : > { %v4795_v33 = vpop.f32.mrb[6].mxu1 }
 0x786   : > { %v1540_v34 = vpop.f32.mrb[7].mxu1 }
 0x787   : > { %v1549_v35 = vpack.c.bf16 %v4795_v33, %v1540_v34 }
 0x789   : > { %4799 = vmatmul.mubr.msk.bf16.vlgmr.msra.gmra.mrb[12].mxu0 %vm844_vm3, %v1549_v35 }
 0x790   : > { %v4808_v36 = vpop.f32.mrb[12].mxu1 }
 0x791   : > { %v1692_v20 = vmul.f32 0.35355338, %v4808_v36  ;;  %v1682_v37 = vpop.f32.mrb[13].mxu1 }
 0x792   : > { %v1691_v38 = vmul.f32 0.35355338, %v1682_v37  ;;  %v1920_v37 = vld [vmem:[%s5491_s3 + $0x40] sm:$0xff] }
 0x793   : > { %v1694_v39 = vadd.f32 %v1692_v20, %v5562_v31  ;;  %v1912_v20 = vld [vmem:[%s5491_s3] sm:$0xff] }
 0x794   : > { %v1693_v40 = vadd.f32 %v1691_v38, %v5562_v31  ;;  %v1913_v38 = vld [vmem:[%s5491_s3 + $0x8] sm:$0xff] }
 0x795   : > { %v1698_v41 = vsel %vm932_vm6, %v1694_v39, -inf }
 0x796   : > { %1699 = vmax.xlane.f32.xlu0 %v1698_v41  ;;  %v1695_v3 = vsel %vm932_vm6, %v1693_v40, -inf  ;;  %v4329_v41 = vcombine.low %v1912_v20, %v1920_v37 }
 0x797   : > { %1696 = vmax.xlane.f32.xlu1 %v1695_v3 }
 0x823   : > { %v1700_v42 = vpop.xlane.xlu0 %1699 }
 0x824   : > { %v1702_v43 = vsub.f32 %v1694_v39, %v1700_v42  ;;  %v1697_v44 = vpop.xlane.xlu1 %1696  ;;  %v4330_v39 = vcombine.high %v1912_v20, %v1920_v37  ;;  %v1918_v37 = vld [vmem:[%s5491_s3 + $0x30] sm:$0xff] }
 0x825   : > { %v1701_v45 = vsub.f32 %v1693_v40, %v1697_v44  ;;  %v1921_v40 = vld [vmem:[%s5491_s3 + $0x48] sm:$0xff]  ;;  %v1936_v44 = vld [vmem:[%s5491_s3 + $0xc0] sm:$0xff] }
 0x826   : > { %v1705_v46 = vmul.f32 1.442695, %v1702_v43  ;;  %v4331_v3 = vcombine.low %v1913_v38, %v1921_v40  ;;  %v4332_v42 = vcombine.high %v1913_v38, %v1921_v40  ;;  %v1928_v43 = vld [vmem:[%s5491_s3 + $0x80] sm:$0xff]  ;;  %v1926_v38 = vld [vmem:[%s5491_s3 + $0x70] sm:$0xff]  ;;  %v1927_v40 = vld [vmem:[%s5491_s3 + $0x78] sm:$0xff] }
 0x827   : > { %v1703_v47 = vmul.f32 1.442695, %v1701_v45  ;;  %v1929_v45 = vld [vmem:[%s5491_s3 + $0x88] sm:$0xff] }
 0x828   : > { %5152 = vpow2.f32 %v1705_v46  ;;  %v4346_v46 = vcombine.high %v1928_v43, %v1936_v44 }
 0x829   : > { %5154 = vpow2.f32 %v1703_v47  ;;  %v1937_v47 = vld [vmem:[%s5491_s3 + $0xc8] sm:$0xff] }
 0x832   : > { %v5153_v48 = vpop.eup %5152 }
 0x833   : > { %v5155_v49 = vpop.eup %5154  ;;  %v1710_v50 = vsel %vm932_vm6, %v5153_v48, 0.0 }
 0x834   : > { %1711 = vadd.xlane.f32.xlu1 %v1710_v50  ;;  %v1707_v31 = vsel %vm932_vm6, %v5155_v49, 0.0  ;;  %v4348_v50 = vcombine.high %v1929_v45, %v1937_v47 }
 0x835   : > { %1708 = vadd.xlane.f32.xlu0 %v1707_v31  ;;  %v1914_v31 = vld [vmem:[%s5491_s3 + $0x10] sm:$0xff] }
 0x84b   : > { %4994 = vrot.lane.b32.xlu0 %v5535_v15, %s5283_s22 }
 0x85c   : > { %v1591_v52 = vpop.f32.mrb[12].mxu0 }
 0x85d   : > { %v1598_v53 = vadd.f32 %v1591_v52, %v5603_v51  ;;  %v4800_v55 = vpop.f32.mrb[13].mxu0  ;;  %v1922_v52 = vld [vmem:[%s5491_s3 + $0x50] sm:$0xff] }
 0x85e   : > { %v1594_v56 = vpop.f32.mrb[14].mxu0  ;;  %v5284_v55 = vmov 0  }
 0x85f   : > { %v1599_v57 = vadd.f32 %v1594_v56, %v5605_v54  ;;  %v4801_v58 = vpop.f32.mrb[15].mxu0  ;;  %v1805_v54 = vld [vmem:[%s5468_s15 + $0xc] sm:$0xf]  ;;  %v4334_v56 = vcombine.high %v1914_v31, %v1922_v52 }
 0x860   : > { %v1810_v4 = vsel %vm1253_vm7, %v1805_v54, 0  ;;  %v4333_v58 = vcombine.low %v1914_v31, %v1922_v52  ;;  %v4327_v54 = vld [vmem:[%s6097_s20] ss:$0 sm:$0xff]  ;;  %s6103_s20 = sld [smem:[#allocation25_spill]] (!%p4500_p1) }
 0x861   : > { %4817 = vmatpush3.bf16.msra.mxu1 %v1810_v4 }
 0x862   : > { %2234 = vmatprep.subr.bf16.mxu1 %v4332_v42  ;;  %v4342_v42 = vcombine.high %v1918_v37, %v1926_v38 }
 0x8c1   : > { %v1712_v59 = vpop.xlane.xlu1 %1711 }
 0x8c2   : > { %5156 = vrcp.f32 %v1712_v59  ;;  %v1709_v60 = vpop.xlane.xlu0 %1708 }
 0x8c3   : > { %5158 = vrcp.f32 %v1709_v60 }
 0x8c6   : > { %v4995_v61 = vpop.permute.xlu0 %4994 }
 0x8c7   : > { %v4997_v62 = vunpack.i.h.bf16 %v4995_v61  ;;  %v4996_v63 = vunpack.i.l.bf16 %v4995_v61 }
 0x8c9   : > { %v4866_v0 = vpack.c.bf16 %v4997_v62, %v4996_v63 }
 0x8cb   : > { %4867 = vmatprep.subr.bf16.mxu0 %v4866_v0 }
 0x8cc   : > { %v5157_v15 = vpop.eup %5156  ;;  %4869 = vmatpush3.bf16.msra.mxu0 %v4866_v0 }
 0x8cd   : > { %v5159_v1 = vpop.eup %5158  ;;  %v1716_v2 = vmul.f32 %v5157_v15, %v5153_v48  ;;  %2191 = vmatprep.subr.bf16.mxu0 %v4330_v39  ;;  %v4345_v48 = vcombine.low %v1928_v43, %v1936_v44  ;;  %v1919_v39 = vld [vmem:[%s5491_s3 + $0x38] sm:$0xff]  ;;  %v1934_v44 = vld [vmem:[%s5491_s3 + $0xb0] sm:$0xff] }
 0x8ce   : > { %v1714_v51 = vmul.f32 %v5159_v1, %v5155_v49  ;;  %v4347_v49 = vcombine.low %v1929_v45, %v1937_v47  ;;  %v4344_v43 = vcombine.high %v1919_v39, %v1927_v40  ;;  %v1942_v45 = vld [vmem:[%s5491_s3 + $0xf0] sm:$0xff]  ;;  %v1943_v47 = vld [vmem:[%s5491_s3 + $0xf8] sm:$0xff] }
 0x8cf   : > { %v4357_v52 = vcombine.low %v1934_v44, %v1942_v45 }
 0x8d0   : > { %4813 = vmatprep.mubr.msk.f32.mxu0 %vm932_vm6, %v1714_v51 }
 0x8d1   : > { %4814 = vmatmul.mubr.msk.f32.vlgmr.msra.gmra.mrb[16].mxu0 %vm932_vm6, %v1716_v2 }
 0x8d2   : > { %2192 = vmatpush1.bf16.msra.mxu0 %v4329_v41  ;;  %2223 = vmatprep.mubr.bf16.mxu0 %v5284_v55 }
 0x8d3   : > { %2193 = vmatprep.subr.bf16.mxu0 %v4346_v46  ;;  %v1935_v46 = vld [vmem:[%s5491_s3 + $0xb8] sm:$0xff] }
 0x8d4   : > { %v4360_v31 = vcombine.high %v1935_v46, %v1943_v47 }
 0x8d6   : > { %2194 = vmatpush1.bf16.msra.mxu0 %v4345_v48  ;;  %v4341_v48 = vcombine.low %v1918_v37, %v1926_v38 }
 0x8d7   : > { %2277 = vmatprep.subr.bf16.mxu0 %v4334_v56  ;;  %v5000_v56 = vld [vmem:[%s5497_s0 + $0x40] sm:$0xff]  }
 0x9a4   : > { %v4815_v5 = vpop.f32.mrb[16].mxu0 }
 0x9a5   : > { %v1795_v6 = vpop.f32.mrb[17].mxu0 }
 0x9a6   : > { %v1804_v7 = vpack.c.bf16 %v4815_v5, %v1795_v6 }
 0x9a8   : > { %4819 = vmatmul.mubr.msk.bf16.vlgmr.msra.gmra.mrb[16].mxu1 %vm844_vm3, %v1804_v7  ;;  %v4328_v7 = vld [vmem:[%s6098_s27] ss:$0 sm:$0xff]  ;;  %s6104_s27 = sld [smem:[#allocation27_spill]] (!%p4500_p1) }
 0x9a9   : > { %2235 = vmatpush1.bf16.msra.mxu1 %v4331_v3  ;;  %2266 = vmatprep.mubr.bf16.mxu1 %v5284_v55 }
 0x9aa   : > { %2236 = vmatprep.subr.bf16.mxu1 %v4348_v50  ;;  %v4358_v50 = vcombine.high %v1934_v44, %v1942_v45 }
 0x9ad   : > { %2237 = vmatpush1.bf16.msra.mxu1 %v4347_v49  ;;  %v4343_v49 = vcombine.low %v1919_v39, %v1927_v40 }
 0xa7b   : > { %v1846_v8 = vpop.f32.mrb[16].mxu1 }
 0xa7c   : > { %v1853_v11 = vadd.f32 %v1846_v8, %v1598_v53  ;;  %v4820_v12 = vpop.f32.mrb[17].mxu1  ;;  %v1915_v53 = vld [vmem:[%s5491_s3 + $0x18] sm:$0xff] }
 0xa7d   : > { %v1849_v14 = vpop.f32.mrb[18].mxu1  ;;  %v1931_v12 = vld [vmem:[%s5491_s3 + $0x98] sm:$0xff] }
 0xa7e   : > { %v1862_v16 = vadd.f32 %v4326_v9, %v1853_v11  ;;  %v1854_v17 = vadd.f32 %v1849_v14, %v1599_v57  ;;  %v4821_v18 = vpop.f32.mrb[19].mxu1  ;;  %v1923_v57 = vld [vmem:[%s5491_s3 + $0x58] sm:$0xff]  ;;  %v1938_v11 = vld [vmem:[%s5491_s3 + $0xd0] sm:$0xff] }
 0xa7f   : > { %v4335_v59 = vcombine.low %v1915_v53, %v1923_v57  ;;  %v4336_v60 = vcombine.high %v1915_v53, %v1923_v57  ;;  %v1939_v14 = vld [vmem:[%s5491_s3 + $0xd8] sm:$0xff]  ;;  %v4359_v53 = vcombine.low %v1935_v46, %v1943_v47  ;;  %v5001_v57 = vld [vmem:[%s5497_s0 + $0xc0] sm:$0xff]  }
 0xa80   : > { %v1863_v19 = vadd.f32 %v4326_v9, %v1854_v17  ;;  %v1864_v22 = vadd.f32 %v5168_v21, %v1862_v16  ;;  %v1930_v9 = vld [vmem:[%s5491_s3 + $0x90] sm:$0xff]  ;;  %v4352_v21 = vcombine.high %v1931_v12, %v1939_v14 }
 0xa81   : > { %2320 = vmatprep.subr.bf16.mxu1 %v4336_v60  ;;  %v5004_v60 = vld [vmem:[%s5497_s0 + $0x48] sm:$0xff]  }
 0xa82   : > { %v1868_v23 = vsel %vm793_vm2, %v1864_v22, 0.0  ;;  %v1865_v10 = vadd.f32 %v5169_v24, %v1863_v19  ;;  %v4350_v19 = vcombine.high %v1930_v9, %v1938_v11  ;;  %v1917_v24 = vld [vmem:[%s5491_s3 + $0x28] sm:$0xff] }
 0xa83   : > { %1869 = vadd.xlane.f32.xlu1 %v1868_v23  ;;  %v1924_v23 = vld [vmem:[%s5491_s3 + $0x60] sm:$0xff] }
 0xa84   : > { %v1871_v25 = vsel %vm793_vm2, %v1865_v10, 0.0 }
 0xa87   : > { %1872 = vadd.xlane.f32.xlu1 %v1871_v25  ;;  %v4349_v25 = vcombine.low %v1930_v9, %v1938_v11  ;;  %v5020_v9 = vld [vmem:[%s5497_s0 + $0x68] sm:$0xff]  }
 0xa88   : > { %v5021_v11 = vld [vmem:[%s5497_s0 + $0xe8] sm:$0xff]  }
 0xb10   : > { %v1870_v13 = vpop.xlane.xlu1 %1869 }
 0xb11   : > { %v1875_v26 = vmul.f32 0.03125, %v1870_v13  ;;  %v4351_v13 = vcombine.low %v1931_v12, %v1939_v14  ;;  %v5022_v12 = vld [vmem:[%s5497_s0 + $0x28] sm:$0xff]  }
 0xb12   : > { %v5023_v14 = vld [vmem:[%s5497_s0 + $0xa8] sm:$0xff]  }
 0xb13   : > { %v1877_v28 = vsub.f32 %v1864_v22, %v1875_v26  ;;  %v1916_v22 = vld [vmem:[%s5491_s3 + $0x20] sm:$0xff] }
 0xb14   : > { %v1873_v29 = vpop.xlane.xlu1 %1872  ;;  %v4338_v26 = vcombine.high %v1916_v22, %v1924_v23 }
 0xb15   : > { %v1876_v30 = vmul.f32 0.03125, %v1873_v29  ;;  %v1879_v32 = vmul.f32 %v1877_v28, %v1877_v28  ;;  %v1932_v29 = vld [vmem:[%s5491_s3 + $0xa0] sm:$0xff] }
 0xb17   : > { %v1878_v33 = vsub.f32 %v1865_v10, %v1876_v30  ;;  %v1881_v34 = vsel %vm793_vm2, %v1879_v32, 0.0  ;;  %v1925_v10 = vld [vmem:[%s5491_s3 + $0x68] sm:$0xff]  ;;  %v1940_v30 = vld [vmem:[%s5491_s3 + $0xe0] sm:$0xff] }
 0xb18   : > { %1882 = vadd.xlane.f32.xlu1 %v1881_v34  ;;  %v1933_v32 = vld [vmem:[%s5491_s3 + $0xa8] sm:$0xff]  ;;  %v4337_v34 = vcombine.low %v1916_v22, %v1924_v23  ;;  %v4353_v41 = vcombine.low %v1932_v29, %v1940_v30  ;;  %v5027_v22 = vld [vmem:[%s5497_s0 + $0xb0] sm:$0xff]   ;;  %v5028_v23 = vld [vmem:[%s5497_s0 + $0x78] sm:$0xff]  }
 0xb19   : > { %v1880_v35 = vmul.f32 %v1878_v33, %v1878_v33 }
 0xb1b   : > { %v1884_v36 = vsel %vm793_vm2, %v1880_v35, 0.0  ;;  %v4339_v35 = vcombine.low %v1917_v24, %v1925_v10 }
 0xb1c   : > { %1885 = vadd.xlane.f32.xlu1 %v1884_v36  ;;  %v4354_v36 = vcombine.high %v1932_v29, %v1940_v30  ;;  %v5767_v30 = vld [vmem:[%s5486_s16 + $0x8] sm:$0xff] }
 0xba5   : > { %v1883_v61 = vpop.xlane.xlu1 %1882 }
 0xba6   : > { %v1887_v62 = vmul.f32 0.03125, %v1883_v61  ;;  %v5005_v61 = vld [vmem:[%s5497_s0 + $0xc8] sm:$0xff]  }
 0xba8   : > { %v1889_v63 = vadd.f32 1e-05, %v1887_v62  ;;  %v5007_v62 = vld [vmem:[%s5497_s0 + $0x88] sm:$0xff]  }
 0xba9   : > { %v1886_v0 = vpop.xlane.xlu1 %1885 }
 0xbaa   : > { %5160 = vrsqrt.f32 %v1889_v63  ;;  %v1888_v15 = vmul.f32 0.03125, %v1886_v0  ;;  %v5008_v63 = vld [vmem:[%s5497_s0 + $0x50] sm:$0xff]  }
 0xbab   : > { %v5009_v0 = vld [vmem:[%s5497_s0 + $0xd0] sm:$0xff]  }
 0xbac   : > { %v1890_v1 = vadd.f32 1e-05, %v1888_v15  ;;  %v5010_v15 = vld [vmem:[%s5497_s0 + $0x10] sm:$0xff]  }
 0xbae   : > { %5162 = vrsqrt.f32 %v1890_v1  ;;  %v5011_v1 = vld [vmem:[%s5497_s0 + $0x90] sm:$0xff]  }
 0xbb4   : > { %v5161_v51 = vpop.eup %5160 }
 0xbb5   : > { %v1893_v2 = vmul.f32 %v5161_v51, %v1877_v28  ;;  %v4340_v28 = vcombine.high %v1917_v24, %v1925_v10  ;;  %v5012_v51 = vld [vmem:[%s5497_s0 + $0x58] sm:$0xff]  }
 0xbb6   : > { %v5029_v24 = vld [vmem:[%s5497_s0 + $0xf8] sm:$0xff]  }
 0xbb7   : > { %v1901_v5 = vmul.f32 %v4327_v54, %v1893_v2  ;;  %v5013_v2 = vld [vmem:[%s5497_s0 + $0xd8] sm:$0xff]  }
 0xbb8   : > { %v5163_v4 = vpop.eup %5162  ;;  %v5030_v10 = vld [vmem:[%s5497_s0 + $0x38] sm:$0xff]  }
 0xbb9   : > { %v1894_v6 = vmul.f32 %v5163_v4, %v1878_v33  ;;  %v5682_v16 = vadd.f32 %v4328_v7, %v1901_v5  ;;  %v1941_v33 = vld [vmem:[%s5491_s3 + $0xe8] sm:$0xff]  ;;  %v5015_v4 = vld [vmem:[%s5497_s0 + $0x98] sm:$0xff]   ;;  %v5016_v5 = vld [vmem:[%s5497_s0 + $0x60] sm:$0xff]  }
 0xbba   : > { %v4356_v20 = vcombine.high %v1933_v32, %v1941_v33  ;;  %v4355_v3 = vcombine.low %v1933_v32, %v1941_v33 }
 0xbbb   : > { %v1902_v8 = vmul.f32 %v4327_v54, %v1894_v6  ;;  %v5014_v54 = vld [vmem:[%s5497_s0 + $0x18] sm:$0xff]   ;;  %v5017_v6 = vld [vmem:[%s5497_s0 + $0xe0] sm:$0xff]  }
 0xbbd   : > { %v5684_v17 = vadd.f32 %v4328_v7, %v1902_v8  ;;  %v5018_v7 = vld [vmem:[%s5497_s0 + $0x20] sm:$0xff]  }
 0xbbe   : > { %v5019_v8 = vld [vmem:[%s5497_s0 + $0xa0] sm:$0xff]  }
 0xbbf   : > { %v5688_v18 = vpack.c.bf16 %v5684_v17, %v5682_v16 }
 0xbc1   : > { %4361 = vmatmul.mubr.msk.bf16.vlgmr.msra.gmra.mrb[20].mxu0 %vm793_vm2, %v5688_v18  ;;  %4362 = vmatmul.mubr.msk.bf16.vlgmr.msra.gmra.mrb[20].mxu1 %vm793_vm2, %v5688_v18 }
 0xbc2   : > { %2278 = vmatpush1.bf16.msra.mxu0 %v4333_v58  ;;  %2321 = vmatpush1.bf16.msra.mxu1 %v4335_v59  ;;  %v5002_v58 = vld [vmem:[%s5497_s0] sm:$0xff]  }
 0xbc3   : > { %2279 = vmatprep.subr.bf16.mxu0 %v4350_v19  ;;  %2322 = vmatprep.subr.bf16.mxu1 %v4352_v21  ;;  %v5003_v59 = vld [vmem:[%s5497_s0 + $0x80] sm:$0xff]   ;;  %v5025_v19 = vld [vmem:[%s5497_s0 + $0xf0] sm:$0xff]  }
 0xbc4   : > { %2309 = vmatprep.mubr.bf16.mxu0 %v5284_v55  ;;  %2352 = vmatprep.mubr.bf16.mxu1 %v5284_v55  ;;  %v5026_v21 = vld [vmem:[%s5497_s0 + $0x30] sm:$0xff]  }
 0xbc6   : > { %2280 = vmatpush1.bf16.msra.mxu0 %v4349_v25  ;;  %2323 = vmatpush1.bf16.msra.mxu1 %v4351_v13  ;;  %v5031_v25 = vld [vmem:[%s5497_s0 + $0xb8] sm:$0xff]   ;;  %v5032_v13 = vld [vmem:[%s5497_s0 + $0x140] sm:$0xff]  }
 0xbc7   : > { %2363 = vmatprep.subr.bf16.mxu0 %v4338_v26  ;;  %2406 = vmatprep.subr.bf16.mxu1 %v4340_v28  ;;  %v5033_v26 = vld [vmem:[%s5497_s0 + $0x1c0] sm:$0xff]   ;;  %v5763_v28 = vshrl.u32 %v766_v27, 7 }
 0xbc9   : > { %4363 = vmatmul.mubr.msk.bf16.vlgmr.msra.gmra.mrb[24].mxu0 %vm793_vm2, %v5688_v18  ;;  %4364 = vmatmul.mubr.msk.bf16.vlgmr.msra.gmra.mrb[24].mxu1 %vm793_vm2, %v5688_v18  ;;  %v1974_v29 = vsub.s32 6, %v5763_v28  ;;  %v1950_v33 = vsub.s32 0, %v5763_v28  ;;  %v1966_v40 = vsub.s32 4, %v5763_v28 }
 0xbca   : > { %2364 = vmatpush1.bf16.msra.mxu0 %v4337_v34  ;;  %2407 = vmatpush1.bf16.msra.mxu1 %v4339_v35  ;;  %v1958_v34 = vsub.s32 2, %v5763_v28  ;;  %v1944_v35 = vld [vmem:[%s5486_s16] sm:$0xff] }
 0xbcb   : > { %2365 = vmatprep.subr.bf16.mxu0 %v4354_v36  ;;  %2408 = vmatprep.subr.bf16.mxu1 %v4356_v20  ;;  %v5770_v32 = vrot.slane %v5767_v30, %v1974_v29  ;;  %v1954_v36 = vsub.s32 1, %v5763_v28  ;;  %v1962_v20 = vsub.s32 3, %v5763_v28  ;;  %v1951_v37 = vrot.slane %v1944_v35, %v1950_v33 }
 0xbcc   : > { %2395 = vmatprep.mubr.bf16.mxu0 %v5284_v55  ;;  %2438 = vmatprep.mubr.bf16.mxu1 %v5284_v55  ;;  %v1959_v38 = vrot.slane %v1944_v35, %v1958_v34 }
 0xbcd   : > { %v1955_v27 = vrot.slane %v1944_v35, %v1954_v36  ;;  %v1963_v39 = vrot.slane %v1944_v35, %v1962_v20 }
 0xbce   : > { %2366 = vmatpush1.bf16.msra.mxu0 %v4353_v41  ;;  %2409 = vmatpush1.bf16.msra.mxu1 %v4355_v3 }
 0xbcf   : > { %2449 = vmatprep.subr.bf16.mxu0 %v4342_v42  ;;  %2492 = vmatprep.subr.bf16.mxu1 %v4344_v43  ;;  %v1970_v42 = vsub.s32 5, %v5763_v28  ;;  %v1978_v43 = vsub.s32 7, %v5763_v28 }
 0xbd1   : > { %4365 = vmatmul.mubr.msk.bf16.vlgmr.msra.gmra.mrb[28].mxu0 %vm793_vm2, %v5688_v18  ;;  %4366 = vmatmul.mubr.msk.bf16.vlgmr.msra.gmra.mrb[28].mxu1 %vm793_vm2, %v5688_v18 }
 0xbd2   : > { %2450 = vmatpush1.bf16.msra.mxu0 %v4341_v48  ;;  %2493 = vmatpush1.bf16.msra.mxu1 %v4343_v49 }
 0xbd3   : > { %2451 = vmatprep.subr.bf16.mxu0 %v4358_v50  ;;  %2494 = vmatprep.subr.bf16.mxu1 %v4360_v31 }
 0xbd4   : > { %2481 = vmatprep.mubr.bf16.mxu0 %v5284_v55  ;;  %2524 = vmatprep.mubr.bf16.mxu1 %v5284_v55  ;;  %v5006_v55 = vld [vmem:[%s5497_s0 + $0x8] sm:$0xff]  }
 0xbd6   : > { %2452 = vmatpush1.bf16.msra.mxu0 %v4357_v52  ;;  %2495 = vmatpush1.bf16.msra.mxu1 %v4359_v53 }
 0xbd7   : > { %4555 = vmatprep.subr.bf16.mxu0 %v5000_v56  ;;  %4577 = vmatprep.subr.bf16.mxu1 %v5001_v57 }
 0xbd9   : > { %4367 = vmatmul.mubr.msk.bf16.vlgmr.msra.gmra.mrb[32].mxu0 %vm793_vm2, %v5688_v18  ;;  %4368 = vmatmul.mubr.msk.bf16.vlgmr.msra.gmra.mrb[32].mxu1 %vm793_vm2, %v5688_v18  ;;  %v5024_v18 = vld [vmem:[%s5497_s0 + $0x70] sm:$0xff]  }
 0xbda   : > { %4556 = vmatpush3.bf16.msra.mxu0 %v5002_v58  ;;  %4578 = vmatpush3.bf16.msra.mxu1 %v5003_v59  ;;  %v1967_v58 = vrot.slane %v1944_v35, %v1966_v40  ;;  %v1975_v59 = vrot.slane %v1944_v35, %v1974_v29 }
 0xbdb   : > { %4557 = vmatprep.subr.bf16.mxu0 %v5004_v60  ;;  %4579 = vmatprep.subr.bf16.mxu1 %v5005_v61 }
 0xbde   : > { %4558 = vmatpush3.bf16.msra.mxu0 %v5006_v55  ;;  %4580 = vmatpush3.bf16.msra.mxu1 %v5007_v62  ;;  %v1971_v55 = vrot.slane %v1944_v35, %v1970_v42  ;;  %v1979_v62 = vrot.slane %v1944_v35, %v1978_v43  ;;  %v1991_v35 = vrot.slane %v5767_v30, %v1958_v34 }
 0xbdf   : > { %4559 = vmatprep.subr.bf16.mxu0 %v5008_v63  ;;  %4581 = vmatprep.subr.bf16.mxu1 %v5009_v0  ;;  %v1995_v34 = vrot.slane %v5767_v30, %v1962_v20 }
 0xbe2   : > { %4560 = vmatpush3.bf16.msra.mxu0 %v5010_v15  ;;  %4582 = vmatpush3.bf16.msra.mxu1 %v5011_v1 }
 0xbe3   : > { %4561 = vmatprep.subr.bf16.mxu0 %v5012_v51  ;;  %4583 = vmatprep.subr.bf16.mxu1 %v5013_v2 }
 0xbe6   : > { %4562 = vmatpush3.bf16.msra.mxu0 %v5014_v54  ;;  %4584 = vmatpush3.bf16.msra.mxu1 %v5015_v4 }
 0xbe7   : > { %4563 = vmatprep.subr.bf16.mxu0 %v5016_v5  ;;  %4585 = vmatprep.subr.bf16.mxu1 %v5017_v6 }
 0xbea   : > { %4564 = vmatpush3.bf16.msra.mxu0 %v5018_v7  ;;  %4586 = vmatpush3.bf16.msra.mxu1 %v5019_v8 }
 0xbeb   : > { %4565 = vmatprep.subr.bf16.mxu0 %v5020_v9  ;;  %4587 = vmatprep.subr.bf16.mxu1 %v5021_v11 }
 0xbee   : > { %4566 = vmatpush3.bf16.msra.mxu0 %v5022_v12  ;;  %4588 = vmatpush3.bf16.msra.mxu1 %v5023_v14  ;;  %v5034_v12 = vld [vmem:[%s5497_s0 + $0x100] sm:$0xff]  }
 0xbef   : > { %4567 = vmatprep.subr.bf16.mxu0 %v5024_v18  ;;  %4589 = vmatprep.subr.bf16.mxu1 %v5025_v19  ;;  %v5035_v14 = vld [vmem:[%s5497_s0 + $0x180] sm:$0xff]  }
 0xbf2   : > { %4568 = vmatpush3.bf16.msra.mxu0 %v5026_v21  ;;  %4590 = vmatpush3.bf16.msra.mxu1 %v5027_v22 }
 0xbf3   : > { %4569 = vmatprep.subr.bf16.mxu0 %v5028_v23  ;;  %4591 = vmatprep.subr.bf16.mxu1 %v5029_v24  ;;  %v5036_v23 = vld [vmem:[%s5497_s0 + $0x148] sm:$0xff]  }
 0xbf4   : > { %v5037_v24 = vld [vmem:[%s5497_s0 + $0x1c8] sm:$0xff]  }
 0xbf6   : > { %4570 = vmatpush3.bf16.msra.mxu0 %v5030_v10  ;;  %4592 = vmatpush3.bf16.msra.mxu1 %v5031_v25  ;;  %v1983_v10 = vrot.slane %v5767_v30, %v1950_v33  ;;  %v1987_v33 = vrot.slane %v5767_v30, %v1954_v36  ;;  %v5041_v36 = vld [vmem:[%s5497_s0 + $0x1d0] sm:$0xff]  }
 0xbf7   : > { %4599 = vmatprep.subr.bf16.mxu0 %v5032_v13  ;;  %4621 = vmatprep.subr.bf16.mxu1 %v5033_v26 }
 0xc94   : > { %v2225_v41 = vpop.f32.mrb[20].mxu0  ;;  %v2268_v3 = vpop.f32.mrb[20].mxu1 }
 0xc95   : > { %v2226_v44 = vadd.f32 %v2225_v41, %v1951_v37  ;;  %v2269_v45 = vadd.f32 %v2268_v3, %v1959_v38  ;;  %v2227_v46 = vpop.f32.mrb[21].mxu0  ;;  %v2270_v47 = vpop.f32.mrb[21].mxu1 }
 0xc96   : > { %v2228_v48 = vadd.f32 %v2227_v46, %v1955_v27  ;;  %v2271_v49 = vadd.f32 %v2270_v47, %v1963_v39  ;;  %v2229_v50 = vpop.f32.mrb[22].mxu0  ;;  %v2272_v31 = vpop.f32.mrb[22].mxu1 }
 0xc97   : > { %v2230_v52 = vadd.f32 %v2229_v50, %v1951_v37  ;;  %v2273_v53 = vadd.f32 %v2272_v31, %v1959_v38  ;;  %v2231_v56 = vpop.f32.mrb[23].mxu0  ;;  %v2274_v57 = vpop.f32.mrb[23].mxu1  ;;  %v2535_v63 = vmax.f32 %v2226_v44, 0.0  ;;  %v2537_v0 = vmax.f32 %v2269_v45, 0.0  ;;  %v5038_v44 = vld [vmem:[%s5497_s0 + $0x108] sm:$0xff]   ;;  %v5040_v50 = vld [vmem:[%s5497_s0 + $0x150] sm:$0xff]  }
 0xc98   : > { %v2232_v60 = vadd.f32 %v2231_v56, %v1955_v27  ;;  %v2275_v61 = vadd.f32 %v2274_v57, %v1963_v39  ;;  %v2536_v51 = vmax.f32 %v2228_v48, 0.0  ;;  %v2538_v2 = vmax.f32 %v2271_v49, 0.0  ;;  %v5039_v45 = vld [vmem:[%s5497_s0 + $0x188] sm:$0xff]  }
 0xc99   : > { %v2551_v15 = vmax.f32 %v2230_v52, 0.0  ;;  %v2553_v1 = vmax.f32 %v2273_v53, 0.0 }
 0xc9a   : > { %v2552_v54 = vmax.f32 %v2232_v60, 0.0  ;;  %v2554_v4 = vmax.f32 %v2275_v61, 0.0 }
 0xc9b   : > { %v2567_v5 = vpack.c.bf16 %v2551_v15, %v2535_v63  ;;  %v2569_v6 = vpack.c.bf16 %v2553_v1, %v2537_v0 }
 0xc9c   : > { %v2568_v7 = vpack.c.bf16 %v2552_v54, %v2536_v51  ;;  %v2570_v8 = vpack.c.bf16 %v2554_v4, %v2538_v2  ;;  %v2311_v9 = vpop.f32.mrb[24].mxu0  ;;  %v2354_v11 = vpop.f32.mrb[24].mxu1  ;;  %v5044_v51 = vld [vmem:[%s5497_s0 + $0x158] sm:$0xff]  }
 0xc9d   : > { %v2312_v18 = vadd.f32 %v2311_v9, %v1967_v58  ;;  %v2355_v19 = vadd.f32 %v2354_v11, %v1975_v59  ;;  %v2313_v21 = vpop.f32.mrb[25].mxu0  ;;  %v2356_v22 = vpop.f32.mrb[25].mxu1  ;;  %v5045_v2 = vld [vmem:[%s5497_s0 + $0x1d8] sm:$0xff]  }
 0xc9e   : > { %v2314_v25 = vadd.f32 %v2313_v21, %v1971_v55  ;;  %v2357_v13 = vadd.f32 %v2356_v22, %v1979_v62  ;;  %v2315_v26 = vpop.f32.mrb[26].mxu0  ;;  %v2358_v29 = vpop.f32.mrb[26].mxu1  ;;  %3646 = vmatprep.mubr.bf16.mxu0 %v2568_v7  ;;  %3687 = vmatprep.mubr.bf16.mxu1 %v2570_v8  ;;  %v5046_v21 = vld [vmem:[%s5497_s0 + $0x118] sm:$0xff]  }
 0xc9f   : > { %v2316_v37 = vadd.f32 %v2315_v26, %v1967_v58  ;;  %v2359_v38 = vadd.f32 %v2358_v29, %v1975_v59  ;;  %v2317_v27 = vpop.f32.mrb[27].mxu0  ;;  %v2360_v39 = vpop.f32.mrb[27].mxu1  ;;  %3647 = vmatmul.mubr.bf16.vlgmr.msra.gmra.mrb[36].mxu0 %v2567_v5  ;;  %3688 = vmatmul.mubr.bf16.vlgmr.msra.gmra.mrb[36].mxu1 %v2569_v6  ;;  %v2539_v46 = vmax.f32 %v2312_v18, 0.0  ;;  %v2541_v47 = vmax.f32 %v2355_v19, 0.0  ;;  %v5047_v22 = vld [vmem:[%s5497_s0 + $0x198] sm:$0xff]  }
 0xca0   : > { %v2318_v41 = vadd.f32 %v2317_v27, %v1971_v55  ;;  %v2361_v3 = vadd.f32 %v2360_v39, %v1979_v62  ;;  %4600 = vmatpush3.bf16.msra.mxu0 %v5034_v12  ;;  %4622 = vmatpush3.bf16.msra.mxu1 %v5035_v14  ;;  %v2540_v31 = vmax.f32 %v2314_v25, 0.0  ;;  %v2542_v52 = vmax.f32 %v2357_v13, 0.0  ;;  %v5042_v55 = vld [vmem:[%s5497_s0 + $0x110] sm:$0xff]  }
 0xca1   : > { %v2555_v48 = vmax.f32 %v2316_v37, 0.0  ;;  %v2557_v49 = vmax.f32 %v2359_v38, 0.0  ;;  %4601 = vmatprep.subr.bf16.mxu0 %v5036_v23  ;;  %4623 = vmatprep.subr.bf16.mxu1 %v5037_v24  ;;  %v5043_v62 = vld [vmem:[%s5497_s0 + $0x190] sm:$0xff]   ;;  %v1999_v12 = vrot.slane %v5767_v30, %v1966_v40  ;;  %v2003_v14 = vrot.slane %v5767_v30, %v1970_v42  ;;  %v5048_v40 = vld [vmem:[%s5497_s0 + $0x160] sm:$0xff]  }
 0xca2   : > { %v2556_v53 = vmax.f32 %v2318_v41, 0.0  ;;  %v2558_v56 = vmax.f32 %v2361_v3, 0.0  ;;  %v2011_v23 = vrot.slane %v5767_v30, %v1978_v43  ;;  %v5049_v42 = vld [vmem:[%s5497_s0 + $0x1e0] sm:$0xff]  }
 0xca3   : > { %v5806_v57 = vpack.c.bf16 %v2555_v48, %v2539_v46  ;;  %v5808_v58 = vpack.c.bf16 %v2557_v49, %v2541_v47  ;;  %v5051_v41 = vld [vmem:[%s5497_s0 + $0x1a0] sm:$0xff]   ;;  %v5052_v46 = vld [vmem:[%s5497_s0 + $0x168] sm:$0xff]  }
 0xca4   : > { %v2572_v20 = vpack.c.bf16 %v2556_v53, %v2540_v31  ;;  %v2574_v59 = vpack.c.bf16 %v2558_v56, %v2542_v52  ;;  %4602 = vmatpush3.bf16.msra.mxu0 %v5038_v44  ;;  %4624 = vmatpush3.bf16.msra.mxu1 %v5039_v45  ;;  %v2397_v60 = vpop.f32.mrb[28].mxu0  ;;  %v2440_v61 = vpop.f32.mrb[28].mxu1  ;;  %v5053_v47 = vld [vmem:[%s5497_s0 + $0x1e8] sm:$0xff]  }
 0xca5   : > { %v2398_v63 = vadd.f32 %v2397_v60, %v1983_v10  ;;  %v2441_v0 = vadd.f32 %v2440_v61, %v1991_v35  ;;  %v2399_v15 = vpop.f32.mrb[29].mxu0  ;;  %v2442_v1 = vpop.f32.mrb[29].mxu1  ;;  %4603 = vmatprep.subr.bf16.mxu0 %v5040_v50  ;;  %4625 = vmatprep.subr.bf16.mxu1 %v5041_v36  ;;  %v5054_v60 = vld [vmem:[%s5497_s0 + $0x128] sm:$0xff]  }
 0xca6   : > { %v2400_v54 = vadd.f32 %v2399_v15, %v1987_v33  ;;  %v2443_v4 = vadd.f32 %v2442_v1, %v1995_v34  ;;  %v2401_v5 = vpop.f32.mrb[30].mxu0  ;;  %v2444_v6 = vpop.f32.mrb[30].mxu1  ;;  %3728 = vmatprep.mubr.bf16.mxu0 %v2572_v20  ;;  %3769 = vmatprep.mubr.bf16.mxu1 %v2574_v59  ;;  %v5055_v61 = vld [vmem:[%s5497_s0 + $0x1a8] sm:$0xff]   ;;  %v5056_v15 = vld [vmem:[%s5497_s0 + $0x170] sm:$0xff]  }
 0xca7   : > { %v2402_v7 = vadd.f32 %v2401_v5, %v1983_v10  ;;  %v2445_v8 = vadd.f32 %v2444_v6, %v1991_v35  ;;  %v2403_v9 = vpop.f32.mrb[31].mxu0  ;;  %v2446_v11 = vpop.f32.mrb[31].mxu1  ;;  %v2543_v24 = vmax.f32 %v2398_v63, 0.0  ;;  %v2545_v10 = vmax.f32 %v2441_v0, 0.0 }
 0xca8   : > { %v2404_v18 = vadd.f32 %v2403_v9, %v1987_v33  ;;  %v2447_v19 = vadd.f32 %v2446_v11, %v1995_v34  ;;  %4604 = vmatpush3.bf16.msra.mxu0 %v5042_v55  ;;  %4626 = vmatpush3.bf16.msra.mxu1 %v5043_v62  ;;  %v2544_v26 = vmax.f32 %v2400_v54, 0.0  ;;  %v2546_v29 = vmax.f32 %v2443_v4, 0.0  ;;  %v5050_v33 = vld [vmem:[%s5497_s0 + $0x120] sm:$0xff]   ;;  %v5059_v9 = vld [vmem:[%s5497_s0 + $0x1b0] sm:$0xff]   ;;  %v5060_v11 = vld [vmem:[%s5497_s0 + $0x178] sm:$0xff]  }
 0xca9   : > { %v2559_v25 = vmax.f32 %v2402_v7, 0.0  ;;  %v2561_v13 = vmax.f32 %v2445_v8, 0.0  ;;  %4605 = vmatprep.subr.bf16.mxu0 %v5044_v51  ;;  %4627 = vmatprep.subr.bf16.mxu1 %v5045_v2  ;;  %v5058_v8 = vld [vmem:[%s5497_s0 + $0x130] sm:$0xff]  }
 0xcaa   : > { %v2560_v35 = vmax.f32 %v2404_v18, 0.0  ;;  %v2562_v37 = vmax.f32 %v2447_v19, 0.0  ;;  %v5063_v18 = vld [vmem:[%s5497_s0 + $0x1b8] sm:$0xff]   ;;  %v5064_v19 = vld [vmem:[%s5497_s0 + $0x240] sm:$0xff]  }
 0xcab   : > { %v5827_v38 = vpack.c.bf16 %v2559_v25, %v2543_v24  ;;  %v5829_v28 = vpack.c.bf16 %v2561_v13, %v2545_v10  ;;  %v5068_v24 = vld [vmem:[%s5497_s0 + $0x248] sm:$0xff]  }
 0xcac   : > { %v5831_v30 = vpack.c.bf16 %v2560_v35, %v2544_v26  ;;  %v5833_v43 = vpack.c.bf16 %v2562_v37, %v2546_v29  ;;  %4606 = vmatpush3.bf16.msra.mxu0 %v5046_v21  ;;  %4628 = vmatpush3.bf16.msra.mxu1 %v5047_v22  ;;  %v2483_v27 = vpop.f32.mrb[32].mxu0  ;;  %v2526_v39 = vpop.f32.mrb[32].mxu1  ;;  %v5065_v21 = vld [vmem:[%s5497_s0 + $0x2c0] sm:$0xff]   ;;  %v5069_v10 = vld [vmem:[%s5497_s0 + $0x2c8] sm:$0xff]   ;;  %v5076_v26 = vld [vmem:[%s5497_s0 + $0x258] sm:$0xff]  }
 0xcad   : > { %v2484_v3 = vadd.f32 %v2483_v27, %v1999_v12  ;;  %v2527_v44 = vadd.f32 %v2526_v39, %v5770_v32  ;;  %v2485_v45 = vpop.f32.mrb[33].mxu0  ;;  %v2528_v34 = vpop.f32.mrb[33].mxu1  ;;  %4607 = vmatprep.subr.bf16.mxu0 %v5048_v40  ;;  %4629 = vmatprep.subr.bf16.mxu1 %v5049_v42  ;;  %v5066_v22 = vld [vmem:[%s5497_s0 + $0x200] sm:$0xff]   ;;  %v5070_v25 = vld [vmem:[%s5497_s0 + $0x208] sm:$0xff]   ;;  %v5072_v40 = vld [vmem:[%s5497_s0 + $0x250] sm:$0xff]  }
 0xcae   : > { %v2486_v48 = vadd.f32 %v2485_v45, %v2003_v14  ;;  %v2529_v49 = vadd.f32 %v2528_v34, %v2011_v23  ;;  %v2487_v50 = vpop.f32.mrb[34].mxu0  ;;  %v2530_v36 = vpop.f32.mrb[34].mxu1  ;;  %v5071_v13 = vld [vmem:[%s5497_s0 + $0x288] sm:$0xff]   ;;  %v5075_v42 = vld [vmem:[%s5497_s0 + $0x290] sm:$0xff]   ;;  %v5077_v29 = vld [vmem:[%s5497_s0 + $0x2d8] sm:$0xff]  }
 0xcaf   : > { %v2488_v31 = vadd.f32 %v2487_v50, %v1999_v12  ;;  %v2531_v52 = vadd.f32 %v2530_v36, %v5770_v32  ;;  %v2489_v53 = vpop.f32.mrb[35].mxu0  ;;  %v2532_v56 = vpop.f32.mrb[35].mxu1  ;;  %v2547_v55 = vmax.f32 %v2484_v3, 0.0  ;;  %v2549_v62 = vmax.f32 %v2527_v44, 0.0  ;;  %v5057_v32 = vld [vmem:[%s5497_s0 + $0x1f0] sm:$0xff]   ;;  %v5061_v12 = vld [vmem:[%s5497_s0 + $0x1f8] sm:$0xff]  }
 0xcb0   : > { %v2490_v20 = vadd.f32 %v2489_v53, %v2003_v14  ;;  %v2533_v59 = vadd.f32 %v2532_v56, %v2011_v23  ;;  %4608 = vmatpush3.bf16.msra.mxu0 %v5050_v33  ;;  %4630 = vmatpush3.bf16.msra.mxu1 %v5051_v41  ;;  %v2548_v1 = vmax.f32 %v2486_v48, 0.0  ;;  %v2550_v51 = vmax.f32 %v2529_v49, 0.0  ;;  %v5062_v14 = vld [vmem:[%s5497_s0 + $0x138] sm:$0xff]   ;;  %v5067_v23 = vld [vmem:[%s5497_s0 + $0x280] sm:$0xff]   ;;  %v5084_v33 = vld [vmem:[%s5497_s0 + $0x268] sm:$0xff]  }
 0xcb1   : > { %v2563_v63 = vmax.f32 %v2488_v31, 0.0  ;;  %v2565_v0 = vmax.f32 %v2531_v52, 0.0  ;;  %4609 = vmatprep.subr.bf16.mxu0 %v5052_v46  ;;  %4631 = vmatprep.subr.bf16.mxu1 %v5053_v47  ;;  %v5078_v35 = vld [vmem:[%s5497_s0 + $0x218] sm:$0xff]   ;;  %v5082_v27 = vld [vmem:[%s5497_s0 + $0x220] sm:$0xff]   ;;  %v5085_v41 = vld [vmem:[%s5497_s0 + $0x2e8] sm:$0xff]  }
 0xcb2   : > { %v2564_v2 = vmax.f32 %v2490_v20, 0.0  ;;  %v2566_v54 = vmax.f32 %v2533_v59, 0.0  ;;  %v5079_v37 = vld [vmem:[%s5497_s0 + $0x298] sm:$0xff]   ;;  %v5083_v39 = vld [vmem:[%s5497_s0 + $0x2a0] sm:$0xff]   ;;  %v5086_v3 = vld [vmem:[%s5497_s0 + $0x228] sm:$0xff]  }
 0xcb3   : > { %v5845_v4 = vpack.c.bf16 %v2563_v63, %v2547_v55  ;;  %v5847_v5 = vpack.c.bf16 %v2565_v0, %v2549_v62  ;;  %v5087_v44 = vld [vmem:[%s5497_s0 + $0x2a8] sm:$0xff]   ;;  %v5088_v45 = vld [vmem:[%s5497_s0 + $0x270] sm:$0xff]   ;;  %v5092_v48 = vld [vmem:[%s5497_s0 + $0x278] sm:$0xff]  }
 0xcb4   : > { %v5849_v6 = vpack.c.bf16 %v2564_v2, %v2548_v1  ;;  %v5851_v7 = vpack.c.bf16 %v2566_v54, %v2550_v51  ;;  %4610 = vmatpush3.bf16.msra.mxu0 %v5054_v60  ;;  %4632 = vmatpush3.bf16.msra.mxu1 %v5055_v61  ;;  %v5089_v34 = vld [vmem:[%s5497_s0 + $0x2f0] sm:$0xff]   ;;  %v5093_v49 = vld [vmem:[%s5497_s0 + $0x2f8] sm:$0xff]   ;;  %v5096_v31 = vld [vmem:[%s5497_s0 + $0x340] sm:$0xff]  }
 0xcb5   : > { %4611 = vmatprep.subr.bf16.mxu0 %v5056_v15  ;;  %4633 = vmatprep.subr.bf16.mxu1 %v5057_v32  ;;  %v5090_v46 = vld [vmem:[%s5497_s0 + $0x230] sm:$0xff]   ;;  %v5094_v50 = vld [vmem:[%s5497_s0 + $0x238] sm:$0xff]   ;;  %v5097_v52 = vld [vmem:[%s5497_s0 + $0x3c0] sm:$0xff]  }
 0xcb6   : > { %v5091_v47 = vld [vmem:[%s5497_s0 + $0x2b0] sm:$0xff]   ;;  %v5095_v36 = vld [vmem:[%s5497_s0 + $0x2b8] sm:$0xff]   ;;  %v5098_v53 = vld [vmem:[%s5497_s0 + $0x300] sm:$0xff]  }
 0xcb7   : > { %v5099_v56 = vld [vmem:[%s5497_s0 + $0x380] sm:$0xff]   ;;  %v5100_v20 = vld [vmem:[%s5497_s0 + $0x348] sm:$0xff]   ;;  %v5104_v55 = vld [vmem:[%s5497_s0 + $0x350] sm:$0xff]  }
 0xcb8   : > { %4612 = vmatpush3.bf16.msra.mxu0 %v5058_v8  ;;  %4634 = vmatpush3.bf16.msra.mxu1 %v5059_v9  ;;  %v5101_v59 = vld [vmem:[%s5497_s0 + $0x3c8] sm:$0xff]   ;;  %v5107_v62 = vld [vmem:[%s5497_s0 + $0x390] sm:$0xff]   ;;  %v5108_v63 = vld [vmem:[%s5497_s0 + $0x358] sm:$0xff]  }
 0xcb9   : > { %4613 = vmatprep.subr.bf16.mxu0 %v5060_v11  ;;  %4635 = vmatprep.subr.bf16.mxu1 %v5061_v12  ;;  %v5102_v60 = vld [vmem:[%s5497_s0 + $0x308] sm:$0xff]   ;;  %v5109_v0 = vld [vmem:[%s5497_s0 + $0x3d8] sm:$0xff]   ;;  %v5112_v1 = vld [vmem:[%s5497_s0 + $0x360] sm:$0xff]  }
 0xcba   : > { %v5103_v61 = vld [vmem:[%s5497_s0 + $0x388] sm:$0xff]   ;;  %v5110_v15 = vld [vmem:[%s5497_s0 + $0x318] sm:$0xff]   ;;  %v5113_v51 = vld [vmem:[%s5497_s0 + $0x3e0] sm:$0xff]  }
 0xcbb   : > { %v5111_v32 = vld [vmem:[%s5497_s0 + $0x398] sm:$0xff]   ;;  %v5114_v2 = vld [vmem:[%s5497_s0 + $0x320] sm:$0xff]   ;;  %v5118_v8 = vld [vmem:[%s5497_s0 + $0x328] sm:$0xff]  }
 0xcbc   : > { %4614 = vmatpush3.bf16.msra.mxu0 %v5062_v14  ;;  %4636 = vmatpush3.bf16.msra.mxu1 %v5063_v18  ;;  %v5115_v54 = vld [vmem:[%s5497_s0 + $0x3a0] sm:$0xff]   ;;  %v5119_v9 = vld [vmem:[%s5497_s0 + $0x3a8] sm:$0xff]   ;;  %v5120_v11 = vld [vmem:[%s5497_s0 + $0x370] sm:$0xff]  }
 0xcbd   : > { %4643 = vmatprep.subr.bf16.mxu0 %v5064_v19  ;;  %4665 = vmatprep.subr.bf16.mxu1 %v5065_v21  ;;  %v5121_v12 = vld [vmem:[%s5497_s0 + $0x3f0] sm:$0xff]   ;;  %v5124_v19 = vld [vmem:[%s5497_s0 + $0x378] sm:$0xff]  }
 0xcbe   : > { %v5122_v14 = vld [vmem:[%s5497_s0 + $0x330] sm:$0xff]   ;;  %v5125_v21 = vld [vmem:[%s5497_s0 + $0x3f8] sm:$0xff]  }
 0xcbf   : > { %3729 = vmatmul.mubr.bf16.vlgmr.msra.gmra.mrb[40].mxu0 %v5806_v57  ;;  %3770 = vmatmul.mubr.bf16.vlgmr.msra.gmra.mrb[40].mxu1 %v5808_v58  ;;  %v5073_v57 = vld [vmem:[%s5497_s0 + $0x2d0] sm:$0xff]  }
 0xcc0   : > { %4644 = vmatpush3.bf16.msra.mxu0 %v5066_v22  ;;  %3810 = vmatprep.mubr.bf16.mxu0 %v5831_v30  ;;  %v5074_v58 = vld [vmem:[%s5497_s0 + $0x210] sm:$0xff]   ;;  %v5080_v30 = vld [vmem:[%s5497_s0 + $0x260] sm:$0xff]   ;;  %v5126_v22 = vld [vmem:[%s5497_s0 + $0x338] sm:$0xff]  }
 0xcc1   : > { %4666 = vmatpush3.bf16.msra.mxu1 %v5067_v23  ;;  %3851 = vmatprep.mubr.bf16.mxu1 %v5833_v43  ;;  %v5081_v43 = vld [vmem:[%s5497_s0 + $0x2e0] sm:$0xff]   ;;  %v5123_v18 = vld [vmem:[%s5497_s0 + $0x3b0] sm:$0xff]   ;;  %v5127_v23 = vld [vmem:[%s5497_s0 + $0x3b8] sm:$0xff]  }
 0xcc2   : > { %4645 = vmatprep.subr.bf16.mxu0 %v5068_v24  ;;  %4667 = vmatprep.subr.bf16.mxu1 %v5069_v10 }
 0xcc4   : > { %4646 = vmatpush3.bf16.msra.mxu0 %v5070_v25  ;;  %v4369_v25 = vld [vmem:[%s746_s26] ss:$0 sm:$0xff] }
 0xcc5   : > { %4668 = vmatpush3.bf16.msra.mxu1 %v5071_v13  ;;  %4647 = vmatprep.subr.bf16.mxu0 %v5072_v40 }
 0xcc6   : > { %4669 = vmatprep.subr.bf16.mxu1 %v5073_v57 }
 0xcc8   : > { %4648 = vmatpush3.bf16.msra.mxu0 %v5074_v58 }
 0xcc9   : > { %4670 = vmatpush3.bf16.msra.mxu1 %v5075_v42  ;;  %4649 = vmatprep.subr.bf16.mxu0 %v5076_v26 }
 0xcca   : > { %4671 = vmatprep.subr.bf16.mxu1 %v5077_v29 }
 0xccc   : > { %4650 = vmatpush3.bf16.msra.mxu0 %v5078_v35 }
 0xccd   : > { %4672 = vmatpush3.bf16.msra.mxu1 %v5079_v37  ;;  %4651 = vmatprep.subr.bf16.mxu0 %v5080_v30 }
 0xcce   : > { %4673 = vmatprep.subr.bf16.mxu1 %v5081_v43 }
 0xcd0   : > { %4652 = vmatpush3.bf16.msra.mxu0 %v5082_v27 }
 0xcd1   : > { %4674 = vmatpush3.bf16.msra.mxu1 %v5083_v39  ;;  %4653 = vmatprep.subr.bf16.mxu0 %v5084_v33 }
 0xcd2   : > { %4675 = vmatprep.subr.bf16.mxu1 %v5085_v41 }
 0xcd4   : > { %4654 = vmatpush3.bf16.msra.mxu0 %v5086_v3 }
 0xcd5   : > { %4676 = vmatpush3.bf16.msra.mxu1 %v5087_v44  ;;  %4655 = vmatprep.subr.bf16.mxu0 %v5088_v45 }
 0xcd6   : > { %4677 = vmatprep.subr.bf16.mxu1 %v5089_v34 }
 0xcd8   : > { %4656 = vmatpush3.bf16.msra.mxu0 %v5090_v46 }
 0xcd9   : > { %4678 = vmatpush3.bf16.msra.mxu1 %v5091_v47  ;;  %4657 = vmatprep.subr.bf16.mxu0 %v5092_v48 }
 0xcda   : > { %4679 = vmatprep.subr.bf16.mxu1 %v5093_v49 }
 0xcdc   : > { %4658 = vmatpush3.bf16.msra.mxu0 %v5094_v50 }
 0xcdd   : > { %4680 = vmatpush3.bf16.msra.mxu1 %v5095_v36  ;;  %4687 = vmatprep.subr.bf16.mxu0 %v5096_v31 }
 0xcde   : > { %4709 = vmatprep.subr.bf16.mxu1 %v5097_v52 }
 0xcdf   : > { %3811 = vmatmul.mubr.bf16.vlgmr.msra.gmra.mrb[44].mxu0 %v5827_v38  ;;  %v5105_v38 = vld [vmem:[%s5497_s0 + $0x3d0] sm:$0xff]  }
 0xce0   : > { %3852 = vmatmul.mubr.bf16.vlgmr.msra.gmra.mrb[44].mxu1 %v5829_v28  ;;  %4688 = vmatpush3.bf16.msra.mxu0 %v5098_v53  ;;  %v5106_v28 = vld [vmem:[%s5497_s0 + $0x310] sm:$0xff]  }
 0xce1   : > { %3892 = vmatprep.mubr.bf16.mxu0 %v5849_v6  ;;  %4710 = vmatpush3.bf16.msra.mxu1 %v5099_v56  ;;  %v5116_v6 = vld [vmem:[%s5497_s0 + $0x368] sm:$0xff]  }
 0xce2   : > { %3933 = vmatprep.mubr.bf16.mxu1 %v5851_v7  ;;  %4689 = vmatprep.subr.bf16.mxu0 %v5100_v20  ;;  %v5117_v7 = vld [vmem:[%s5497_s0 + $0x3e8] sm:$0xff]  }
 0xce3   : > { %4711 = vmatprep.subr.bf16.mxu1 %v5101_v59 }
 0xce4   : > { %4690 = vmatpush3.bf16.msra.mxu0 %v5102_v60 }
 0xce5   : > { %4712 = vmatpush3.bf16.msra.mxu1 %v5103_v61  ;;  %4691 = vmatprep.subr.bf16.mxu0 %v5104_v55 }
 0xce6   : > { %4713 = vmatprep.subr.bf16.mxu1 %v5105_v38 }
 0xce8   : > { %4692 = vmatpush3.bf16.msra.mxu0 %v5106_v28 }
 0xce9   : > { %4714 = vmatpush3.bf16.msra.mxu1 %v5107_v62  ;;  %4693 = vmatprep.subr.bf16.mxu0 %v5108_v63 }
 0xcea   : > { %4715 = vmatprep.subr.bf16.mxu1 %v5109_v0 }
 0xcec   : > { %4694 = vmatpush3.bf16.msra.mxu0 %v5110_v15 }
 0xced   : > { %4716 = vmatpush3.bf16.msra.mxu1 %v5111_v32  ;;  %4695 = vmatprep.subr.bf16.mxu0 %v5112_v1 }
 0xcee   : > { %4717 = vmatprep.subr.bf16.mxu1 %v5113_v51 }
 0xcf0   : > { %4696 = vmatpush3.bf16.msra.mxu0 %v5114_v2 }
 0xcf1   : > { %4718 = vmatpush3.bf16.msra.mxu1 %v5115_v54  ;;  %4697 = vmatprep.subr.bf16.mxu0 %v5116_v6 }
 0xcf2   : > { %4719 = vmatprep.subr.bf16.mxu1 %v5117_v7 }
 0xcf4   : > { %4698 = vmatpush3.bf16.msra.mxu0 %v5118_v8 }
 0xcf5   : > { %4720 = vmatpush3.bf16.msra.mxu1 %v5119_v9  ;;  %4699 = vmatprep.subr.bf16.mxu0 %v5120_v11 }
 0xcf6   : > { %4721 = vmatprep.subr.bf16.mxu1 %v5121_v12 }
 0xcf8   : > { %4700 = vmatpush3.bf16.msra.mxu0 %v5122_v14 }
 0xcf9   : > { %4722 = vmatpush3.bf16.msra.mxu1 %v5123_v18  ;;  %4701 = vmatprep.subr.bf16.mxu0 %v5124_v19 }
 0xcfa   : > { %4723 = vmatprep.subr.bf16.mxu1 %v5125_v21 }
 0xcfc   : > { %4702 = vmatpush3.bf16.msra.mxu0 %v5126_v22 }
 0xcfd   : > { %4724 = vmatpush3.bf16.msra.mxu1 %v5127_v23 }
 0xcff   : > { %3893 = vmatmul.mubr.bf16.vlgmr.msra.gmra.mrb[48].mxu0 %v5845_v4 }
 0xd00   : > { %3934 = vmatmul.mubr.bf16.vlgmr.msra.gmra.mrb[48].mxu1 %v5847_v5 }
 0xd72   : > { %v4571_v24 = vpop.f32.mrb[36].mxu0  ;;  %v4593_v10 = vpop.f32.mrb[36].mxu1 }
 0xd73   : > { %v4572_v13 = vpop.f32.mrb[37].mxu0  ;;  %v4594_v40 = vpop.f32.mrb[37].mxu1 }
 0xd74   : > { %v4573_v57 = vadd.f32 %v4572_v13, %v4571_v24  ;;  %v4595_v58 = vadd.f32 %v4594_v40, %v4593_v10  ;;  %v4574_v42 = vpop.f32.mrb[38].mxu0  ;;  %v4596_v26 = vpop.f32.mrb[38].mxu1 }
 0xd75   : > { %v4575_v29 = vpop.f32.mrb[39].mxu0  ;;  %v4597_v35 = vpop.f32.mrb[39].mxu1 }
 0xd76   : > { %v3649_v37 = vadd.f32 %v4573_v57, %v4369_v25  ;;  %v4576_v30 = vadd.f32 %v4575_v29, %v4574_v42  ;;  %v4598_v4 = vadd.f32 %v4597_v35, %v4596_v26 }
 0xd78   : > { %v3690_v43 = vadd.f32 %v4595_v58, %v3649_v37  ;;  %v3652_v5 = vadd.f32 %v4576_v30, %v4369_v25 }
 0xd7a   : > { %v3693_v27 = vadd.f32 %v4598_v4, %v3652_v5 }
 0xd92   : > { %v4615_v39 = vpop.f32.mrb[40].mxu0  ;;  %v4637_v33 = vpop.f32.mrb[40].mxu1 }
 0xd93   : > { %v4616_v41 = vpop.f32.mrb[41].mxu0  ;;  %v4638_v3 = vpop.f32.mrb[41].mxu1 }
 0xd94   : > { %v4617_v44 = vadd.f32 %v4616_v41, %v4615_v39  ;;  %v4639_v45 = vadd.f32 %v4638_v3, %v4637_v33  ;;  %v4618_v34 = vpop.f32.mrb[42].mxu0  ;;  %v4640_v46 = vpop.f32.mrb[42].mxu1 }
 0xd95   : > { %v4619_v47 = vpop.f32.mrb[43].mxu0  ;;  %v4641_v48 = vpop.f32.mrb[43].mxu1 }
 0xd96   : > { %v3731_v49 = vadd.f32 %v4617_v44, %v3690_v43  ;;  %v4620_v50 = vadd.f32 %v4619_v47, %v4618_v34  ;;  %v4642_v36 = vadd.f32 %v4641_v48, %v4640_v46  ;;  %v4499_v46 = vld [vmem:[%s752_s13] ss:$0 sm:$0xff]  ;;  %s6101_s13 = sld [smem:[#allocation26_spill]] (!%p4500_p1) }
 0xd98   : > { %v3772_v31 = vadd.f32 %v4639_v45, %v3731_v49  ;;  %v3734_v52 = vadd.f32 %v4620_v50, %v3693_v27  ;;  %v4498_v45 = vld [vmem:[%s749_s1] ss:$0 sm:$0xff] }
 0xd9a   : > { %v3775_v53 = vadd.f32 %v4642_v36, %v3734_v52 }
 0xdb2   : > { %v4659_v56 = vpop.f32.mrb[44].mxu0 }
 0xdb3   : > { %v4681_v20 = vpop.f32.mrb[44].mxu1  ;;  %v4660_v59 = vpop.f32.mrb[45].mxu0 }
 0xdb4   : > { %v4661_v60 = vadd.f32 %v4660_v59, %v4659_v56  ;;  %v4682_v61 = vpop.f32.mrb[45].mxu1  ;;  %v4662_v55 = vpop.f32.mrb[46].mxu0 }
 0xdb5   : > { %v4683_v38 = vadd.f32 %v4682_v61, %v4681_v20  ;;  %v4684_v28 = vpop.f32.mrb[46].mxu1  ;;  %v4663_v62 = vpop.f32.mrb[47].mxu0  ;;  %v5170_v61 = vld [vmem:[%s6101_s13] sm:$0xff] (!%p4500_p1)  }
 0xdb6   : > { %v3813_v63 = vadd.f32 %v4661_v60, %v3772_v31  ;;  %v4664_v0 = vadd.f32 %v4663_v62, %v4662_v55  ;;  %v4685_v15 = vpop.f32.mrb[47].mxu1  ;;  %v5285_v55 = vmov (!%p4500_p1), 0.0  }
 0xdb7   : > { %v4686_v32 = vadd.f32 %v4685_v15, %v4684_v28  ;;  %4822 = vmatprep.subr.bf16.mxu0 (!%p4500_p1), %v5285_v55  ;;  %4826 = vmatprep.mubr.msk.bf16.mxu0 (!%p4500_p1), %vm5286_vm9, %v5285_v55  ;;  %v3994_v15 = vld [vmem:[%s6102_s19] sm:$0x1] (!%p4500_p1) }
 0xdb8   : > { %v3854_v1 = vadd.f32 %v4683_v38, %v3813_v63  ;;  %v3816_v51 = vadd.f32 %v4664_v0, %v3775_v53  ;;  %4823 = vmatpush3.bf16.msra.mxu0 (!%p4500_p1), %v5170_v61  ;;  %v5171_v38 = vld [vmem:[%s6101_s13 + $0x8] sm:$0xff] (!%p4500_p1)  }
 0xdb9   : > { %4824 = vmatprep.subr.bf16.mxu0 (!%p4500_p1), %v5285_v55 }
 0xdba   : > { %v3857_v2 = vadd.f32 %v4686_v32, %v3816_v51 }
 0xdbc   : > { %4825 = vmatpush3.bf16.msra.mxu0 (!%p4500_p1), %v5171_v38 }
 0xdd2   : > { %v4703_v54 = vpop.f32.mrb[48].mxu0 }
 0xdd3   : > { %v4725_v6 = vpop.f32.mrb[48].mxu1  ;;  %v4704_v7 = vpop.f32.mrb[49].mxu0 }
 0xdd4   : > { %v4705_v8 = vadd.f32 %v4704_v7, %v4703_v54  ;;  %v4726_v9 = vpop.f32.mrb[49].mxu1  ;;  %v4706_v11 = vpop.f32.mrb[50].mxu0 }
 0xdd5   : > { %v4727_v12 = vadd.f32 %v4726_v9, %v4725_v6  ;;  %v4728_v14 = vpop.f32.mrb[50].mxu1  ;;  %v4707_v18 = vpop.f32.mrb[51].mxu0  ;;  %v4017_v6 = vld [vmem:[%s6104_s27] sm:$0x1] (!%p4500_p1) }
 0xdd6   : > { %v3895_v19 = vadd.f32 %v4705_v8, %v3854_v1  ;;  %v4708_v21 = vadd.f32 %v4707_v18, %v4706_v11  ;;  %v4729_v22 = vpop.f32.mrb[51].mxu1  ;;  %v3995_v1 = vld [vmem:[%s6103_s20] sm:$0x1] (!%p4500_p1) }
 0xdd7   : > { %v4730_v23 = vadd.f32 %v4729_v22, %v4728_v14 }
 0xdd8   : > { %v3936_v24 = vadd.f32 %v4727_v12, %v3895_v19  ;;  %v3898_v10 = vadd.f32 %v4708_v21, %v3857_v2 }
 0xdda   : > { %v3939_v25 = vadd.f32 %v4730_v23, %v3898_v10  ;;  %v3942_v13 = vadd.f32 %v3936_v24, %v5682_v16 }
 0xddc   : > { %v3946_v40 = vsel %vm793_vm2, %v3942_v13, 0.0  ;;  %v3943_v57 = vadd.f32 %v3939_v25, %v5684_v17 }
 0xddd   : > { %3947 = vadd.xlane.f32.xlu1 %v3946_v40 }
 0xdde   : > { %v3949_v58 = vsel %vm793_vm2, %v3943_v57, 0.0 }
 0xde1   : > { %3950 = vadd.xlane.f32.xlu1 %v3949_v58 }
 0xe6a   : > { %v3948_v42 = vpop.xlane.xlu1 %3947 }
 0xe6b   : > { %v3952_v26 = vmul.f32 0.03125, %v3948_v42 }
 0xe6d   : > { %v3954_v29 = vsub.f32 %v3942_v13, %v3952_v26 }
 0xe6e   : > { %v3951_v35 = vpop.xlane.xlu1 %3950 }
 0xe6f   : > { %v3953_v37 = vmul.f32 0.03125, %v3951_v35  ;;  %v3956_v30 = vmul.f32 %v3954_v29, %v3954_v29 }
 0xe71   : > { %v3955_v4 = vsub.f32 %v3943_v57, %v3953_v37  ;;  %v3958_v43 = vsel %vm793_vm2, %v3956_v30, 0.0 }
 0xe72   : > { %3959 = vadd.xlane.f32.xlu0 %v3958_v43 }
 0xe73   : > { %v3957_v16 = vmul.f32 %v3955_v4, %v3955_v4 }
 0xe75   : > { %v3961_v5 = vsel %vm793_vm2, %v3957_v16, 0.0 }
 0xe76   : > { %3962 = vadd.xlane.f32.xlu1 %v3961_v5 }
 0xeff   : > { %v3960_v17 = vpop.xlane.xlu0 %3959 }
 0xf00   : > { %v3964_v27 = vmul.f32 0.03125, %v3960_v17 }
 0xf02   : > { %v3966_v39 = vadd.f32 1e-05, %v3964_v27 }
 0xf03   : > { %v3963_v33 = vpop.xlane.xlu1 %3962 }
 0xf04   : > { %5164 = vrsqrt.f32 %v3966_v39  ;;  %v3965_v41 = vmul.f32 0.03125, %v3963_v33 }
 0xf06   : > { %v3967_v3 = vadd.f32 1e-05, %v3965_v41 }
 0xf08   : > { %5166 = vrsqrt.f32 %v3967_v3 }
 0xf0e   : > { %v5165_v44 = vpop.eup %5164 }
 0xf0f   : > { %v3970_v34 = vmul.f32 %v5165_v44, %v3954_v29 }
 0xf11   : > { %v3978_v47 = vmul.f32 %v4498_v45, %v3970_v34 }
 0xf12   : > { %v5167_v48 = vpop.eup %5166 }
 0xf13   : > { %v3986_v49 = vadd.f32 %v4499_v46, %v3978_v47  ;;  %v3971_v50 = vmul.f32 %v5167_v48, %v3955_v4  ;;  %3993 = sbr.rel (%p4500_p1) target bundleno = 4391 (0x1127), region = 96 }
 0xf15   : > { %3988 = vst.msk [vmem:[#allocation2] sm:$0xff] %vm793_vm2, %v3986_v49  ;;  %v3979_v36 = vmul.f32 %v4498_v45, %v3971_v50  ;;  %v3997_v52 = vsel (!%p4500_p1), %vm3996_vm8, %v3986_v49, 0.0 }
 0xf16   : > { %3998 = vadd.xlane.f32.xlu0 (!%p4500_p1), %v3997_v52 }
 0xf17   : > { %v3987_v31 = vadd.f32 %v4499_v46, %v3979_v36 }
 0xf19   : > { %3989 = vst.msk [vmem:[#allocation2 + $0x8] sm:$0xff] %vm793_vm2, %v3987_v31 }
 0xfa3   : > { %v3999_v53 = vpop.xlane.xlu0 %3998 }
 0xfa4   : > { %v4000_v56 = vmul.f32 0.03125, %v3999_v53 }
 0xfa6   : > { %v4001_v20 = vsub.f32 %v3986_v49, %v4000_v56 }
 0xfa8   : > { %v4002_v59 = vmul.f32 %v4001_v20, %v4001_v20 }
 0xfaa   : > { %v4003_v60 = vsel %vm3996_vm8, %v4002_v59, 0.0 }
 0xfab   : > { %4004 = vadd.xlane.f32.xlu0 %v4003_v60 }
0x1038   : > { %v4005_v28 = vpop.xlane.xlu0 %4004 }
0x1039   : > { %v4006_v62 = vmul.f32 0.03125, %v4005_v28 }
0x103b   : > { %v4007_v63 = vadd.f32 1e-05, %v4006_v62 }
0x103d   : > { %5172 = vrsqrt.f32 %v4007_v63 }
0x1047   : > { %v5173_v0 = vpop.eup %5172 }
0x1048   : > { %v4009_v32 = vmul.f32 %v5173_v0, %v4001_v20 }
0x104a   : > { %v4010_v51 = vmul.f32 %v4009_v32, %v3994_v15 }
0x104c   : > { %v4011_v2 = vadd.f32 %v4010_v51, %v3995_v1 }
0x104e   : > { %v4012_v54 = vpack.c.bf16 %v4011_v2, %v4011_v2 }
0x1050   : > { %4827 = vmatmul.mubr.msk.bf16.vlgmr.msra.gmra.mrb[0].mxu0 %vm793_vm2, %v4012_v54 }
0x1123   : > { %v4067_v7 = vpop.f32.mrb[0].mxu0 }
0x1124   : > { %v4068_v8 = vadd.f32 %v4067_v7, %v4017_v6  ;;  %v4828_v9 = vpop.f32.mrb[1].mxu0 }
0x1125   : > { %v4070_v11 = vpop.f32.mrb[2].mxu0 }
0x1126   : > { %4074 = vst.msk [vmem:[%s5513_s14] sm:$0x1] %vm4073_vm10, %v4068_v8  ;;  %v4829_v12 = vpop.f32.mrb[3].mxu0 }
0x1127 PF: > { %s6105_s3 = sld [smem:[#allocation9_spill]]  ;;  %s6107_s23 = sld [smem:[#allocation28_spill]] }
0x1128   : > { %s4088_s28 = sshll.u32 %s5513_s14, 4  ;;  %s6108_s24 = sand.u32 1, %s5244_s25   ;;  %s4089_s28 = int_to_ptr.vmem [resolvable:$true] %s4088_s28 }
0x1129   : > { %s4076_s1 = scalar_lea.sflag [#allocation4], %s6108_s24  ;;  %s5174_s21 = scalar_lea.vmem %s4089_s28, 16 }
0x112a   : > { %p5175_p2 = scmp.ne.s32.totalorder %s4089_s28, %s5174_s21  ;;  %s5287_s22 = smov [#allocation3]  }
0x112b   : > { %s5178_s7 = sshll.u32 %s5287_s22, 4  ;;  %s5179_s7 = int_to_ptr.vmem [resolvable:$false] %s5178_s7 }
0x112c   : > { %p5176_p4 = pnand %p5175_p2, %p5427_p3  ;;  %s5180_s8 = scalar_lea.vmem %s5179_s7, 32 }
0x112d   : > { %s4504_s0 = sshll.u32 %s6105_s3, 4  ;;  %p5181_p6 = scmp.lt.s32.totalorder %s4089_s28, %s5179_s7 }
0x112e   : > { %s5978_s12 = scalar_lea.hbm %s6107_s23, %s4504_s0  ;;  %p5177_p5 = pneg %p5176_p4 }
0x112f   : > { %p5182_p7 = scmp.lt.s32.totalorder %s5180_s8, %s5174_s21 }
0x1131   : > { %p5183_p8 = por %p5182_p7, %p5181_p6 }
0x1133   : > { %p5184_p10 = pnand %p5183_p8, %p5177_p5 }
0x1135   : > { %5187 = shalt.err (!%p5184_p10)
}
0x1136   : > { %s5188_s14 = scalar_lea.hbm %s5978_s12, 16  ;;  %s5192_s17 = scalar_lea.hbm %s6107_s23, 32 }
0x1137   : > { %p5189_p11 = scmp.ne.s32.totalorder %s5978_s12, %s5188_s14  ;;  %p5193_p0 = scmp.lt.u32.totalorder %s5978_s12, %s6107_s23 }
0x1138   : > { %p5194_p1 = scmp.lt.u32.totalorder %s5192_s17, %s5188_s14  ;;  %p5196_p4 = scmp.lt.u32.totalorder %s5188_s14, %s5978_s12 }
0x1139   : > { %p5190_p12 = pnand %p5189_p11, %p5427_p3 }
0x113a   : > { %p5195_p2 = por %p5194_p1, %p5193_p0 }
0x113b   : > { %p5191_p13 = pneg %p5190_p12 }
0x113c   : > { %p5197_p5 = por %p5196_p4, %p5195_p2 }
0x113e   : > { %p5198_p6 = pnand %p5197_p5, %p5191_p13 }
0x1140   : > { %5201 = shalt.err (!%p5198_p6)
}
0x1141   : > { %4870 = dma.vmem_to_hbm [thread:$0]  (%p5427_p3), %s4089_s28, 16, %s5978_s12, %s4076_s1  }
0x1142 PF: > { %s6109_s30 = sld [smem:[#allocation12_spill]]  ;;  %s6110_s27 = sld [smem:[#allocation6_spill]] }
0x1148   : > { %p4876_p7 = scmp.ge.s32.totalorder %s6109_s30, 2  ;;  %s4100_s0 = sand.u32 1, %s6110_s27  }
0x1149   : > { %s4101_s26 = scalar_lea.sflag [#allocation4], %s4100_s0 }
0x114a   : > { %p4873_p8 = pnand %p4876_p7, %p5437_p9 }
0x114c   : > { %5235 = dma.done.wait (!%p4873_p8), %s4101_s26, 16  }
0x114d   : > { %5237 = vsyncadd (!%p4873_p8), %s4101_s26, 4294967280  ;;  %s30_s30 = sadd.s32 1, %s6109_s30   ;;  %s6112_s29 = sld [smem:[#allocation7_spill]] }
0x114e   : > { %p27_p10 = scmp.ge.s32.totalorder %s30_s30, 6   ;;  %s6113_s26 = sld [smem:[#allocation17_spill]] }
0x114f   : > { %s6114_s27 = sld [smem:[#allocation10_spill]]  ;;  %s6115_s28 = sld [smem:[#allocation11_spill]] }
0x1150   : > { %s6116_s16 = sld [smem:[#allocation13_spill]]  ;;  %s6117_s0 = sld [smem:[#allocation15_spill]] }
0x1151   : > { %s6118_s24 = smov %s5244_s25  ;;  %29 = sbr.rel (!%p27_p10) target bundleno = 17 (0x11), region = 167 }
0x1153   : > { %s6119_s25 = smov %s6112_s29 }
0x1156   : > { %s6120_s29 = smov %s6116_s16 }
0x1158   :  { %4105 = vsyncpa [#allocation4], 1 }
0x1159   :  { %4107 = vsyncpa [#allocation4 + $0x1], 1 }

</bundles_post_ra>
